<compile_context>
chip_gen: v7x
topology: tpu7x:2x2x1
jax: 0.10.0
libtpu: 0.0.40
codegen_flags: <defaults>
</compile_context>

<pallas_src>
import math

import jax
import jax.numpy as jnp
from jax.experimental import pallas as pl
from jax.experimental.pallas import tpu as pltpu

# ----------------------------- model config ---------------------------------
DIM = 32
NUM_HEADS = 4
HEAD_DIM = DIM // NUM_HEADS
MLP_HIDDEN = int(DIM * 4.0)
WINDOW = (4, 4)                       # window_size -> rel-pos bias path enabled
N_TOKENS = WINDOW[0] * WINDOW[1] + 1  # +1 for the [CLS] token
LN_EPS = 1e-5
INIT_VALUES = 1e-5                    # layer-scale gamma init (gamma_1/gamma_2)
BATCH = 2
NEG_INF = -1e30                       # cross-batch attention mask value


# ----------------------- relative position index (glue) ---------------------
def gen_relative_position_index(window_size):
    wh, ww = window_size
    num_relative_distance = (2 * wh - 1) * (2 * ww - 1) + 3
    window_area = wh * ww
    coords = jnp.stack(jnp.meshgrid(jnp.arange(wh), jnp.arange(ww), indexing="ij"))
    coords_flatten = coords.reshape(2, -1)                       # (2, Wh*Ww)
    rel = coords_flatten[:, :, None] - coords_flatten[:, None, :]
    rel = jnp.transpose(rel, (1, 2, 0))                          # (A, A, 2)
    rel0 = (rel[..., 0] + wh - 1) * (2 * ww - 1)
    rel1 = rel[..., 1] + ww - 1
    idx = jnp.zeros((window_area + 1, window_area + 1), dtype=jnp.int32)
    idx = idx.at[1:, 1:].set((rel0 + rel1).astype(jnp.int32))
    idx = idx.at[0, :].set(num_relative_distance - 3)
    idx = idx.at[:, 0].set(num_relative_distance - 2)
    idx = idx.at[0, 0].set(num_relative_distance - 1)
    return idx, num_relative_distance


# ------------------------------- kernel --------------------------------------
def _layernorm(x, w, b):
    mu = jnp.mean(x, axis=-1, keepdims=True)
    xc = x - mu
    var = jnp.mean(xc * xc, axis=-1, keepdims=True)
    return xc * jax.lax.rsqrt(var + LN_EPS) * w + b


def _gelu_exact(x):
    # matches torch.nn.GELU() default (erf formulation)
    return 0.5 * x * (1.0 + jax.lax.erf(x * (1.0 / math.sqrt(2.0))))


def _softmax_lastdim(x):
    m = jnp.max(x, axis=-1, keepdims=True)
    e = jnp.exp(x - m)
    return e * pl.reciprocal(jnp.sum(e, axis=-1, keepdims=True), approx=True)


def block_kernel(x_ref, vec_ref, wf_ref, bf_ref, bias_ref,
                 fc1_w_ref, fc1_b_ref, fc2_w_ref, o_ref):
    f32 = jnp.float32
    bf16 = jnp.bfloat16
    x = x_ref[...]                                               # (BN, C) f32

    # packed (8, C) vector params
    ln1_w, ln1_b = vec_ref[0], vec_ref[1]
    ln2_w, ln2_b = vec_ref[2], vec_ref[3]
    proj_b, fc2_b = vec_ref[4], vec_ref[5]
    g1, g2 = vec_ref[6], vec_ref[7]

    # ----- attention branch: x + gamma_1 * Attn(LN1(x)) -----
    xn = _layernorm(x, ln1_w, ln1_b)                             # (BN, C)

    # One fused projection; columns = [q*scale | k | (W_v @ W_proj) per head].
    qkvp = jnp.dot(xn.astype(bf16), wf_ref[...],
                   preferred_element_type=f32) + bf_ref[0]       # (BN, 6C)

    attn_out = None
    for h in range(NUM_HEADS):
        q_h = qkvp[:, h * HEAD_DIM:(h + 1) * HEAD_DIM]                   # (BN, d)
        k_h = qkvp[:, DIM + h * HEAD_DIM: DIM + (h + 1) * HEAD_DIM]      # (BN, d)
        vp_h = qkvp[:, 2 * DIM + h * DIM: 2 * DIM + (h + 1) * DIM]       # (BN, C)
        # scores over the whole (B*N) token slab; cross-batch logits get -1e30.
        # bias added in the same expression so the raw scores don't stay live.
        s = jnp.einsum("qd,kd->qk", q_h.astype(bf16), k_h.astype(bf16),
                       preferred_element_type=f32) + bias_ref[h]          # (BN, BN)
        p = _softmax_lastdim(s)
        o_h = jnp.dot(p.astype(bf16), vp_h.astype(bf16),
                      preferred_element_type=f32)                         # (BN, C)
        attn_out = o_h if attn_out is None else attn_out + o_h
    x = x + g1 * (attn_out + proj_b)

    # ----- mlp branch: x + gamma_2 * MLP(LN2(x)) -----
    xn2 = _layernorm(x, ln2_w, ln2_b)
    h1 = jnp.dot(xn2.astype(bf16), fc1_w_ref[...],
                 preferred_element_type=f32) + fc1_b_ref[0]
    h1 = _gelu_exact(h1)
    mlp_out = jnp.dot(h1.astype(bf16), fc2_w_ref[...],
                      preferred_element_type=f32) + fc2_b
    o_ref[...] = x + g2 * mlp_out


# ------------------------------- wrapper --------------------------------------
def beit_block(x, params):
    (ln1_w, ln1_b, qkv_w, qkv_b, rel_bias, proj_w, proj_b,
     ln2_w, ln2_b, fc1_w, fc1_b, fc2_w, fc2_b, g1, g2) = params
    B, N, C = x.shape
    BN = B * N
    H, d = NUM_HEADS, HEAD_DIM

    # ---- wrapper-side layout plumbing / weight folding (plain XLA) ----
    x_flat = x.reshape(BN, C)

    # pack the eight (1, C) vector params into one (8, C) slab
    vec_pack = jnp.concatenate(
        [ln1_w, ln1_b, ln2_w, ln2_b, proj_b, fc2_b, g1, g2], axis=0)

    scale = d ** -0.5
    wq = qkv_w[:, :C] * scale                       # q-scale folded into q cols
    wk = qkv_w[:, C:2 * C]
    wv = qkv_w[:, 2 * C:]
    bq = qkv_b[0, :C] * scale
    bv = qkv_b[0, 2 * C:]

    # Fold the per-head output projection into the v columns:
    #   (p_h @ (xn @ Wv_h + bv_h)) @ Wp_h == p_h @ (xn @ (Wv_h @ Wp_h) + bv_h @ Wp_h)
    wvp = [wv[:, h * d:(h + 1) * d] @ proj_w[h * d:(h + 1) * d, :] for h in range(H)]
    bvp = [bv[h * d:(h + 1) * d] @ proj_w[h * d:(h + 1) * d, :] for h in range(H)]
    w_fused = jnp.concatenate([wq, wk] + wvp, axis=1)             # (C, 6C)
    b_fused = jnp.concatenate([bq, jnp.zeros((C,), jnp.float32)] + bvp)[None, :]

    # block-diagonal (over batch) rel-pos bias; cross-batch logits masked off.
    # Constant for fixed (B, N, params) -> hoist/cache outside any hot loop.
    bidx = jnp.arange(BN) // N
    same_batch = bidx[:, None] == bidx[None, :]                   # (BN, BN)
    bias_big = jnp.where(same_batch[None],
                         jnp.tile(rel_bias, (1, B, B)),
                         jnp.float32(NEG_INF))                    # (H, BN, BN)

    # bf16 matmul operands (f32 accumulation in-kernel); halves the weight DMA.
    w_fused_b = w_fused.astype(jnp.bfloat16)
    fc1_w_b = fc1_w.astype(jnp.bfloat16)
    fc2_w_b = fc2_w.astype(jnp.bfloat16)

    inputs = [x_flat, vec_pack, w_fused_b, b_fused, bias_big,
              fc1_w_b, fc1_b, fc2_w_b]

    def full_spec(shape):
        nd = len(shape)
        return pl.BlockSpec(shape, lambda i, _nd=nd: (0,) * _nd)

    out = pl.pallas_call(
        block_kernel,
        out_shape=jax.ShapeDtypeStruct((BN, C), x.dtype),
        grid_spec=pltpu.PrefetchScalarGridSpec(
            num_scalar_prefetch=0,
            grid=(1,),                         # whole problem in one grid step
            in_specs=[full_spec(a.shape) for a in inputs],
            out_specs=full_spec((BN, C)),
        ),
        compiler_params=pltpu.CompilerParams(
            dimension_semantics=("arbitrary",)),
    )(*inputs)
    return out.reshape(B, N, C)


# --------------------------- pure-JAX reference --------------------------------
def beit_block_ref(x, params):
    (ln1_w, ln1_b, qkv_w, qkv_b, rel_bias, proj_w, proj_b,
     ln2_w, ln2_b, fc1_w, fc1_b, fc2_w, fc2_b, g1, g2) = params
    B, N, C = x.shape

    def ln(v, w, b):
        m = v.mean(-1, keepdims=True)
        var = ((v - m) ** 2).mean(-1, keepdims=True)
        return (v - m) / jnp.sqrt(var + LN_EPS) * w + b

    xn = ln(x, ln1_w[0], ln1_b[0])
    qkv = xn @ qkv_w + qkv_b[0]                                   # (B, N, 3C)
    qkv = qkv.reshape(B, N, 3, NUM_HEADS, HEAD_DIM).transpose(2, 0, 3, 1, 4)
    q, k, v = qkv[0], qkv[1], qkv[2]
    q = q * (HEAD_DIM ** -0.5)
    attn = jnp.einsum("bhnd,bhmd->bhnm", q, k) + rel_bias[None]
    attn = jax.nn.softmax(attn, axis=-1)
    out = jnp.einsum("bhnm,bhmd->bhnd", attn, v)
    out = out.transpose(0, 2, 1, 3).reshape(B, N, C)
    out = out @ proj_w + proj_b[0]
    x = x + g1[0] * out

    xn2 = ln(x, ln2_w[0], ln2_b[0])
    h = xn2 @ fc1_w + fc1_b[0]
    h = 0.5 * h * (1.0 + jax.lax.erf(h / math.sqrt(2.0)))
    y = h @ fc2_w + fc2_b[0]
    return x + g2[0] * y


# ------------------------------- main -----------------------------------------
def make_params(key):
    ks = jax.random.split(key, 12)
    f32 = jnp.float32
    ln1_w = jnp.ones((1, DIM), f32)
    ln1_b = jnp.zeros((1, DIM), f32)
    ln2_w = jnp.ones((1, DIM), f32)
    ln2_b = jnp.zeros((1, DIM), f32)
    # PyTorch Linear weights are (out, in); store transposed (in, out).
    qkv_w = (jax.random.normal(ks[0], (DIM, 3 * DIM), f32) * 0.02)
    q_bias = jax.random.normal(ks[1], (DIM,), f32) * 0.02
    k_bias = jnp.zeros((DIM,), f32)                 # registered buffer, always 0
    v_bias = jax.random.normal(ks[2], (DIM,), f32) * 0.02
    qkv_b = jnp.concatenate([q_bias, k_bias, v_bias])[None, :]    # (1, 3C)
    proj_w = jax.random.normal(ks[3], (DIM, DIM), f32) * 0.02
    proj_b = jax.random.normal(ks[4], (1, DIM), f32) * 0.02
    fc1_w = jax.random.normal(ks[5], (DIM, MLP_HIDDEN), f32) * 0.02
    fc1_b = jax.random.normal(ks[6], (1, MLP_HIDDEN), f32) * 0.02
    fc2_w = jax.random.normal(ks[7], (MLP_HIDDEN, DIM), f32) * 0.02
    fc2_b = jax.random.normal(ks[8], (1, DIM), f32) * 0.02
    g1 = jnp.full((1, DIM), INIT_VALUES, f32)
    g2 = jnp.full((1, DIM), INIT_VALUES, f32)

    # relative position bias: gather from table (parameter setup / glue)
    rel_idx, num_rel = gen_relative_position_index(WINDOW)
    table = jax.random.normal(ks[9], (num_rel, NUM_HEADS), f32) * 0.02
    rel_bias = table[rel_idx.reshape(-1)].reshape(N_TOKENS, N_TOKENS, NUM_HEADS)
    rel_bias = jnp.transpose(rel_bias, (2, 0, 1))                 # (nh, N, N)

    return (ln1_w, ln1_b, qkv_w, qkv_b, rel_bias, proj_w, proj_b,
            ln2_w, ln2_b, fc1_w, fc1_b, fc2_w, fc2_b, g1, g2)


if __name__ == "__main__":
    key = jax.random.PRNGKey(0)
    kx, kp = jax.random.split(key)
    x = jax.random.normal(kx, (BATCH, N_TOKENS, DIM), jnp.float32)
    params = make_params(kp)

    out = beit_block(x, params)
    out = jax.block_until_ready(out)

    ref = beit_block_ref(x, params)
    assert out.shape == ref.shape == (BATCH, N_TOKENS, DIM)
    err = float(jnp.max(jnp.abs(out - ref)))
    assert jnp.allclose(out, ref, atol=1e-4, rtol=1e-4), err

    print("KERNEL_OK")
</pallas_src>

<mosaic_0001>
module attributes {stable_mosaic.version = 11 : i64} {
  func.func @block_kernel(%arg0: i32, %arg1: memref<34x32xf32, #tpu.memory_space<vmem>>, %arg2: memref<8x32xf32, #tpu.memory_space<vmem>>, %arg3: memref<32x192xbf16, #tpu.memory_space<vmem>>, %arg4: memref<1x192xf32, #tpu.memory_space<vmem>>, %arg5: memref<4x34x34xf32, #tpu.memory_space<vmem>>, %arg6: memref<32x128xbf16, #tpu.memory_space<vmem>>, %arg7: memref<1x128xf32, #tpu.memory_space<vmem>>, %arg8: memref<128x32xbf16, #tpu.memory_space<vmem>>, %arg9: memref<34x32xf32, #tpu.memory_space<vmem>>) attributes {dimension_semantics = [#tpu.dimension_semantics<arbitrary>], iteration_bounds = array<i64: 1>, scalar_prefetch = 0 : i64, scratch_operands = 0 : i64, tpu.core_type = #tpu.core_type<tc>, window_params = [{pipeline_mode = #tpu.pipeline_mode<synchronous>, transform_indices = @transform_0, window_bounds = array<i64: 34, 32>}, {pipeline_mode = #tpu.pipeline_mode<synchronous>, transform_indices = @transform_1, window_bounds = array<i64: 8, 32>}, {pipeline_mode = #tpu.pipeline_mode<synchronous>, transform_indices = @transform_2, window_bounds = array<i64: 32, 192>}, {pipeline_mode = #tpu.pipeline_mode<synchronous>, transform_indices = @transform_3, window_bounds = array<i64: 1, 192>}, {pipeline_mode = #tpu.pipeline_mode<synchronous>, transform_indices = @transform_4, window_bounds = array<i64: 4, 34, 34>}, {pipeline_mode = #tpu.pipeline_mode<synchronous>, transform_indices = @transform_5, window_bounds = array<i64: 32, 128>}, {pipeline_mode = #tpu.pipeline_mode<synchronous>, transform_indices = @transform_6, window_bounds = array<i64: 1, 128>}, {pipeline_mode = #tpu.pipeline_mode<synchronous>, transform_indices = @transform_7, window_bounds = array<i64: 128, 32>}, {pipeline_mode = #tpu.pipeline_mode<synchronous>, transform_indices = @transform_8, window_bounds = array<i64: 34, 32>}]} {
    %c0 = arith.constant 0 : index
    %c0_0 = arith.constant 0 : index
    %0 = vector.load %arg1[%c0, %c0_0] : memref<34x32xf32, #tpu.memory_space<vmem>>, vector<34x32xf32>
    %c0_1 = arith.constant 0 : index
    %c0_2 = arith.constant 0 : index
    %1 = vector.load %arg2[%c0_1, %c0_2] : memref<8x32xf32, #tpu.memory_space<vmem>>, vector<1x32xf32>
    %2 = vector.shape_cast %1 : vector<1x32xf32> to vector<32xf32>
    %c1 = arith.constant 1 : index
    %c0_3 = arith.constant 0 : index
    %3 = vector.load %arg2[%c1, %c0_3] : memref<8x32xf32, #tpu.memory_space<vmem>>, vector<1x32xf32>
    %4 = vector.shape_cast %3 : vector<1x32xf32> to vector<32xf32>
    %c2 = arith.constant 2 : index
    %c0_4 = arith.constant 0 : index
    %5 = vector.load %arg2[%c2, %c0_4] : memref<8x32xf32, #tpu.memory_space<vmem>>, vector<1x32xf32>
    %6 = vector.shape_cast %5 : vector<1x32xf32> to vector<32xf32>
    %c3 = arith.constant 3 : index
    %c0_5 = arith.constant 0 : index
    %7 = vector.load %arg2[%c3, %c0_5] : memref<8x32xf32, #tpu.memory_space<vmem>>, vector<1x32xf32>
    %8 = vector.shape_cast %7 : vector<1x32xf32> to vector<32xf32>
    %c4 = arith.constant 4 : index
    %c0_6 = arith.constant 0 : index
    %9 = vector.load %arg2[%c4, %c0_6] : memref<8x32xf32, #tpu.memory_space<vmem>>, vector<1x32xf32>
    %10 = vector.shape_cast %9 : vector<1x32xf32> to vector<32xf32>
    %c5 = arith.constant 5 : index
    %c0_7 = arith.constant 0 : index
    %11 = vector.load %arg2[%c5, %c0_7] : memref<8x32xf32, #tpu.memory_space<vmem>>, vector<1x32xf32>
    %12 = vector.shape_cast %11 : vector<1x32xf32> to vector<32xf32>
    %c6 = arith.constant 6 : index
    %c0_8 = arith.constant 0 : index
    %13 = vector.load %arg2[%c6, %c0_8] : memref<8x32xf32, #tpu.memory_space<vmem>>, vector<1x32xf32>
    %14 = vector.shape_cast %13 : vector<1x32xf32> to vector<32xf32>
    %c7 = arith.constant 7 : index
    %c0_9 = arith.constant 0 : index
    %15 = vector.load %arg2[%c7, %c0_9] : memref<8x32xf32, #tpu.memory_space<vmem>>, vector<1x32xf32>
    %16 = vector.shape_cast %15 : vector<1x32xf32> to vector<32xf32>
    %cst = arith.constant dense<0.000000e+00> : vector<34xf32>
    %17 = vector.multi_reduction <add>, %0, %cst [1] : vector<34x32xf32> to vector<34xf32>
    %18 = vector.shape_cast %17 : vector<34xf32> to vector<34x1xf32>
    %cst_10 = arith.constant 3.200000e+01 : f32
    %19 = vector.broadcast %cst_10 : f32 to vector<34x1xf32>
    %20 = arith.divf %18, %19 : vector<34x1xf32>
    %21 = vector.broadcast %20 : vector<34x1xf32> to vector<34x32xf32>
    %22 = arith.subf %0, %21 : vector<34x32xf32>
    %23 = arith.mulf %22, %22 : vector<34x32xf32>
    %cst_11 = arith.constant dense<0.000000e+00> : vector<34xf32>
    %24 = vector.multi_reduction <add>, %23, %cst_11 [1] : vector<34x32xf32> to vector<34xf32>
    %25 = vector.shape_cast %24 : vector<34xf32> to vector<34x1xf32>
    %cst_12 = arith.constant 3.200000e+01 : f32
    %26 = vector.broadcast %cst_12 : f32 to vector<34x1xf32>
    %27 = arith.divf %25, %26 : vector<34x1xf32>
    %cst_13 = arith.constant 9.99999974E-6 : f32
    %28 = vector.broadcast %cst_13 : f32 to vector<34x1xf32>
    %29 = arith.addf %27, %28 : vector<34x1xf32>
    %30 = math.rsqrt %29 : vector<34x1xf32>
    %31 = vector.broadcast %30 : vector<34x1xf32> to vector<34x32xf32>
    %32 = arith.mulf %22, %31 : vector<34x32xf32>
    %33 = vector.shape_cast %2 : vector<32xf32> to vector<1x32xf32>
    %34 = vector.broadcast %33 : vector<1x32xf32> to vector<34x32xf32>
    %35 = arith.mulf %32, %34 : vector<34x32xf32>
    %36 = vector.shape_cast %4 : vector<32xf32> to vector<1x32xf32>
    %37 = vector.broadcast %36 : vector<1x32xf32> to vector<34x32xf32>
    %38 = arith.addf %35, %37 : vector<34x32xf32>
    %39 = arith.truncf %38 : vector<34x32xf32> to vector<34x32xbf16>
    %c0_14 = arith.constant 0 : index
    %c0_15 = arith.constant 0 : index
    %40 = vector.load %arg3[%c0_14, %c0_15] : memref<32x192xbf16, #tpu.memory_space<vmem>>, vector<32x192xbf16>
    %cst_16 = arith.constant dense<0.000000e+00> : vector<34x192xf32>
    %41 = tpu.matmul %39, %40, %cst_16 {dimension_numbers = #tpu.dot_dimension_numbers<[1], [0], [0], [1], [0, 0, 1, 1], [], []>} : vector<34x32xbf16>, vector<32x192xbf16>, vector<34x192xf32> -> vector<34x192xf32>
    %c0_17 = arith.constant 0 : index
    %c0_18 = arith.constant 0 : index
    %42 = vector.load %arg4[%c0_17, %c0_18] : memref<1x192xf32, #tpu.memory_space<vmem>>, vector<1x192xf32>
    %43 = vector.shape_cast %42 : vector<1x192xf32> to vector<192xf32>
    %44 = vector.shape_cast %43 : vector<192xf32> to vector<1x192xf32>
    %45 = vector.broadcast %44 : vector<1x192xf32> to vector<34x192xf32>
    %46 = arith.addf %41, %45 : vector<34x192xf32>
    %47 = vector.extract_strided_slice %46 {offsets = [0, 0], sizes = [34, 8], strides = [1, 1]} : vector<34x192xf32> to vector<34x8xf32>
    %48 = vector.extract_strided_slice %46 {offsets = [0, 32], sizes = [34, 8], strides = [1, 1]} : vector<34x192xf32> to vector<34x8xf32>
    %49 = vector.extract_strided_slice %46 {offsets = [0, 64], sizes = [34, 32], strides = [1, 1]} : vector<34x192xf32> to vector<34x32xf32>
    %50 = arith.truncf %47 : vector<34x8xf32> to vector<34x8xbf16>
    %51 = arith.truncf %48 : vector<34x8xf32> to vector<34x8xbf16>
    "tpu.trace_start"() <{level = 10 : i32, message = "qd,kd->qk"}> : () -> ()
    %cst_19 = arith.constant dense<0.000000e+00> : vector<34x34xf32>
    %52 = tpu.matmul %50, %51, %cst_19 {dimension_numbers = #tpu.dot_dimension_numbers<[1], [1], [0], [0], [0, 0, 1, 0], [], []>} : vector<34x8xbf16>, vector<34x8xbf16>, vector<34x34xf32> -> vector<34x34xf32>
    "tpu.trace_stop"() : () -> ()
    %c0_20 = arith.constant 0 : index
    %c0_21 = arith.constant 0 : index
    %c0_22 = arith.constant 0 : index
    %53 = vector.load %arg5[%c0_20, %c0_21, %c0_22] : memref<4x34x34xf32, #tpu.memory_space<vmem>>, vector<1x34x34xf32>
    %54 = vector.shape_cast %53 : vector<1x34x34xf32> to vector<34x34xf32>
    %55 = arith.addf %52, %54 : vector<34x34xf32>
    %cst_23 = arith.constant dense<0xFF800000> : vector<34xf32>
    %56 = vector.multi_reduction <maximumf>, %55, %cst_23 [1] : vector<34x34xf32> to vector<34xf32>
    %57 = vector.shape_cast %56 : vector<34xf32> to vector<34x1xf32>
    %58 = vector.broadcast %57 : vector<34x1xf32> to vector<34x34xf32>
    %59 = arith.subf %55, %58 : vector<34x34xf32>
    %60 = math.exp %59 : vector<34x34xf32>
    %cst_24 = arith.constant dense<0.000000e+00> : vector<34xf32>
    %61 = vector.multi_reduction <add>, %60, %cst_24 [1] : vector<34x34xf32> to vector<34xf32>
    %62 = vector.shape_cast %61 : vector<34xf32> to vector<34x1xf32>
    %63 = tpu.reciprocal %62 {approx = true} : vector<34x1xf32> -> vector<34x1xf32>
    %64 = vector.broadcast %63 : vector<34x1xf32> to vector<34x34xf32>
    %65 = arith.mulf %60, %64 : vector<34x34xf32>
    %66 = arith.truncf %65 : vector<34x34xf32> to vector<34x34xbf16>
    %67 = arith.truncf %49 : vector<34x32xf32> to vector<34x32xbf16>
    %cst_25 = arith.constant dense<0.000000e+00> : vector<34x32xf32>
    %68 = tpu.matmul %66, %67, %cst_25 {dimension_numbers = #tpu.dot_dimension_numbers<[1], [0], [0], [1], [0, 0, 1, 1], [], []>} : vector<34x34xbf16>, vector<34x32xbf16>, vector<34x32xf32> -> vector<34x32xf32>
    %69 = vector.extract_strided_slice %46 {offsets = [0, 8], sizes = [34, 8], strides = [1, 1]} : vector<34x192xf32> to vector<34x8xf32>
    %70 = vector.extract_strided_slice %46 {offsets = [0, 40], sizes = [34, 8], strides = [1, 1]} : vector<34x192xf32> to vector<34x8xf32>
    %71 = vector.extract_strided_slice %46 {offsets = [0, 96], sizes = [34, 32], strides = [1, 1]} : vector<34x192xf32> to vector<34x32xf32>
    %72 = arith.truncf %69 : vector<34x8xf32> to vector<34x8xbf16>
    %73 = arith.truncf %70 : vector<34x8xf32> to vector<34x8xbf16>
    "tpu.trace_start"() <{level = 10 : i32, message = "qd,kd->qk"}> : () -> ()
    %cst_26 = arith.constant dense<0.000000e+00> : vector<34x34xf32>
    %74 = tpu.matmul %72, %73, %cst_26 {dimension_numbers = #tpu.dot_dimension_numbers<[1], [1], [0], [0], [0, 0, 1, 0], [], []>} : vector<34x8xbf16>, vector<34x8xbf16>, vector<34x34xf32> -> vector<34x34xf32>
    "tpu.trace_stop"() : () -> ()
    %c1_27 = arith.constant 1 : index
    %c0_28 = arith.constant 0 : index
    %c0_29 = arith.constant 0 : index
    %75 = vector.load %arg5[%c1_27, %c0_28, %c0_29] : memref<4x34x34xf32, #tpu.memory_space<vmem>>, vector<1x34x34xf32>
    %76 = vector.shape_cast %75 : vector<1x34x34xf32> to vector<34x34xf32>
    %77 = arith.addf %74, %76 : vector<34x34xf32>
    %cst_30 = arith.constant dense<0xFF800000> : vector<34xf32>
    %78 = vector.multi_reduction <maximumf>, %77, %cst_30 [1] : vector<34x34xf32> to vector<34xf32>
    %79 = vector.shape_cast %78 : vector<34xf32> to vector<34x1xf32>
    %80 = vector.broadcast %79 : vector<34x1xf32> to vector<34x34xf32>
    %81 = arith.subf %77, %80 : vector<34x34xf32>
    %82 = math.exp %81 : vector<34x34xf32>
    %cst_31 = arith.constant dense<0.000000e+00> : vector<34xf32>
    %83 = vector.multi_reduction <add>, %82, %cst_31 [1] : vector<34x34xf32> to vector<34xf32>
    %84 = vector.shape_cast %83 : vector<34xf32> to vector<34x1xf32>
    %85 = tpu.reciprocal %84 {approx = true} : vector<34x1xf32> -> vector<34x1xf32>
    %86 = vector.broadcast %85 : vector<34x1xf32> to vector<34x34xf32>
    %87 = arith.mulf %82, %86 : vector<34x34xf32>
    %88 = arith.truncf %87 : vector<34x34xf32> to vector<34x34xbf16>
    %89 = arith.truncf %71 : vector<34x32xf32> to vector<34x32xbf16>
    %cst_32 = arith.constant dense<0.000000e+00> : vector<34x32xf32>
    %90 = tpu.matmul %88, %89, %cst_32 {dimension_numbers = #tpu.dot_dimension_numbers<[1], [0], [0], [1], [0, 0, 1, 1], [], []>} : vector<34x34xbf16>, vector<34x32xbf16>, vector<34x32xf32> -> vector<34x32xf32>
    %91 = arith.addf %68, %90 : vector<34x32xf32>
    %92 = vector.extract_strided_slice %46 {offsets = [0, 16], sizes = [34, 8], strides = [1, 1]} : vector<34x192xf32> to vector<34x8xf32>
    %93 = vector.extract_strided_slice %46 {offsets = [0, 48], sizes = [34, 8], strides = [1, 1]} : vector<34x192xf32> to vector<34x8xf32>
    %94 = vector.extract_strided_slice %46 {offsets = [0, 128], sizes = [34, 32], strides = [1, 1]} : vector<34x192xf32> to vector<34x32xf32>
    %95 = arith.truncf %92 : vector<34x8xf32> to vector<34x8xbf16>
    %96 = arith.truncf %93 : vector<34x8xf32> to vector<34x8xbf16>
    "tpu.trace_start"() <{level = 10 : i32, message = "qd,kd->qk"}> : () -> ()
    %cst_33 = arith.constant dense<0.000000e+00> : vector<34x34xf32>
    %97 = tpu.matmul %95, %96, %cst_33 {dimension_numbers = #tpu.dot_dimension_numbers<[1], [1], [0], [0], [0, 0, 1, 0], [], []>} : vector<34x8xbf16>, vector<34x8xbf16>, vector<34x34xf32> -> vector<34x34xf32>
    "tpu.trace_stop"() : () -> ()
    %c2_34 = arith.constant 2 : index
    %c0_35 = arith.constant 0 : index
    %c0_36 = arith.constant 0 : index
    %98 = vector.load %arg5[%c2_34, %c0_35, %c0_36] : memref<4x34x34xf32, #tpu.memory_space<vmem>>, vector<1x34x34xf32>
    %99 = vector.shape_cast %98 : vector<1x34x34xf32> to vector<34x34xf32>
    %100 = arith.addf %97, %99 : vector<34x34xf32>
    %cst_37 = arith.constant dense<0xFF800000> : vector<34xf32>
    %101 = vector.multi_reduction <maximumf>, %100, %cst_37 [1] : vector<34x34xf32> to vector<34xf32>
    %102 = vector.shape_cast %101 : vector<34xf32> to vector<34x1xf32>
    %103 = vector.broadcast %102 : vector<34x1xf32> to vector<34x34xf32>
    %104 = arith.subf %100, %103 : vector<34x34xf32>
    %105 = math.exp %104 : vector<34x34xf32>
    %cst_38 = arith.constant dense<0.000000e+00> : vector<34xf32>
    %106 = vector.multi_reduction <add>, %105, %cst_38 [1] : vector<34x34xf32> to vector<34xf32>
    %107 = vector.shape_cast %106 : vector<34xf32> to vector<34x1xf32>
    %108 = tpu.reciprocal %107 {approx = true} : vector<34x1xf32> -> vector<34x1xf32>
    %109 = vector.broadcast %108 : vector<34x1xf32> to vector<34x34xf32>
    %110 = arith.mulf %105, %109 : vector<34x34xf32>
    %111 = arith.truncf %110 : vector<34x34xf32> to vector<34x34xbf16>
    %112 = arith.truncf %94 : vector<34x32xf32> to vector<34x32xbf16>
    %cst_39 = arith.constant dense<0.000000e+00> : vector<34x32xf32>
    %113 = tpu.matmul %111, %112, %cst_39 {dimension_numbers = #tpu.dot_dimension_numbers<[1], [0], [0], [1], [0, 0, 1, 1], [], []>} : vector<34x34xbf16>, vector<34x32xbf16>, vector<34x32xf32> -> vector<34x32xf32>
    %114 = arith.addf %91, %113 : vector<34x32xf32>
    %115 = vector.extract_strided_slice %46 {offsets = [0, 24], sizes = [34, 8], strides = [1, 1]} : vector<34x192xf32> to vector<34x8xf32>
    %116 = vector.extract_strided_slice %46 {offsets = [0, 56], sizes = [34, 8], strides = [1, 1]} : vector<34x192xf32> to vector<34x8xf32>
    %117 = vector.extract_strided_slice %46 {offsets = [0, 160], sizes = [34, 32], strides = [1, 1]} : vector<34x192xf32> to vector<34x32xf32>
    %118 = arith.truncf %115 : vector<34x8xf32> to vector<34x8xbf16>
    %119 = arith.truncf %116 : vector<34x8xf32> to vector<34x8xbf16>
    "tpu.trace_start"() <{level = 10 : i32, message = "qd,kd->qk"}> : () -> ()
    %cst_40 = arith.constant dense<0.000000e+00> : vector<34x34xf32>
    %120 = tpu.matmul %118, %119, %cst_40 {dimension_numbers = #tpu.dot_dimension_numbers<[1], [1], [0], [0], [0, 0, 1, 0], [], []>} : vector<34x8xbf16>, vector<34x8xbf16>, vector<34x34xf32> -> vector<34x34xf32>
    "tpu.trace_stop"() : () -> ()
    %c3_41 = arith.constant 3 : index
    %c0_42 = arith.constant 0 : index
    %c0_43 = arith.constant 0 : index
    %121 = vector.load %arg5[%c3_41, %c0_42, %c0_43] : memref<4x34x34xf32, #tpu.memory_space<vmem>>, vector<1x34x34xf32>
    %122 = vector.shape_cast %121 : vector<1x34x34xf32> to vector<34x34xf32>
    %123 = arith.addf %120, %122 : vector<34x34xf32>
    %cst_44 = arith.constant dense<0xFF800000> : vector<34xf32>
    %124 = vector.multi_reduction <maximumf>, %123, %cst_44 [1] : vector<34x34xf32> to vector<34xf32>
    %125 = vector.shape_cast %124 : vector<34xf32> to vector<34x1xf32>
    %126 = vector.broadcast %125 : vector<34x1xf32> to vector<34x34xf32>
    %127 = arith.subf %123, %126 : vector<34x34xf32>
    %128 = math.exp %127 : vector<34x34xf32>
    %cst_45 = arith.constant dense<0.000000e+00> : vector<34xf32>
    %129 = vector.multi_reduction <add>, %128, %cst_45 [1] : vector<34x34xf32> to vector<34xf32>
    %130 = vector.shape_cast %129 : vector<34xf32> to vector<34x1xf32>
    %131 = tpu.reciprocal %130 {approx = true} : vector<34x1xf32> -> vector<34x1xf32>
    %132 = vector.broadcast %131 : vector<34x1xf32> to vector<34x34xf32>
    %133 = arith.mulf %128, %132 : vector<34x34xf32>
    %134 = arith.truncf %133 : vector<34x34xf32> to vector<34x34xbf16>
    %135 = arith.truncf %117 : vector<34x32xf32> to vector<34x32xbf16>
    %cst_46 = arith.constant dense<0.000000e+00> : vector<34x32xf32>
    %136 = tpu.matmul %134, %135, %cst_46 {dimension_numbers = #tpu.dot_dimension_numbers<[1], [0], [0], [1], [0, 0, 1, 1], [], []>} : vector<34x34xbf16>, vector<34x32xbf16>, vector<34x32xf32> -> vector<34x32xf32>
    %137 = arith.addf %114, %136 : vector<34x32xf32>
    %138 = vector.shape_cast %10 : vector<32xf32> to vector<1x32xf32>
    %139 = vector.broadcast %138 : vector<1x32xf32> to vector<34x32xf32>
    %140 = arith.addf %137, %139 : vector<34x32xf32>
    %141 = vector.shape_cast %14 : vector<32xf32> to vector<1x32xf32>
    %142 = vector.broadcast %141 : vector<1x32xf32> to vector<34x32xf32>
    %143 = arith.mulf %142, %140 : vector<34x32xf32>
    %144 = arith.addf %0, %143 : vector<34x32xf32>
    %cst_47 = arith.constant dense<0.000000e+00> : vector<34xf32>
    %145 = vector.multi_reduction <add>, %144, %cst_47 [1] : vector<34x32xf32> to vector<34xf32>
    %146 = vector.shape_cast %145 : vector<34xf32> to vector<34x1xf32>
    %cst_48 = arith.constant 3.200000e+01 : f32
    %147 = vector.broadcast %cst_48 : f32 to vector<34x1xf32>
    %148 = arith.divf %146, %147 : vector<34x1xf32>
    %149 = vector.broadcast %148 : vector<34x1xf32> to vector<34x32xf32>
    %150 = arith.subf %144, %149 : vector<34x32xf32>
    %151 = arith.mulf %150, %150 : vector<34x32xf32>
    %cst_49 = arith.constant dense<0.000000e+00> : vector<34xf32>
    %152 = vector.multi_reduction <add>, %151, %cst_49 [1] : vector<34x32xf32> to vector<34xf32>
    %153 = vector.shape_cast %152 : vector<34xf32> to vector<34x1xf32>
    %cst_50 = arith.constant 3.200000e+01 : f32
    %154 = vector.broadcast %cst_50 : f32 to vector<34x1xf32>
    %155 = arith.divf %153, %154 : vector<34x1xf32>
    %cst_51 = arith.constant 9.99999974E-6 : f32
    %156 = vector.broadcast %cst_51 : f32 to vector<34x1xf32>
    %157 = arith.addf %155, %156 : vector<34x1xf32>
    %158 = math.rsqrt %157 : vector<34x1xf32>
    %159 = vector.broadcast %158 : vector<34x1xf32> to vector<34x32xf32>
    %160 = arith.mulf %150, %159 : vector<34x32xf32>
    %161 = vector.shape_cast %6 : vector<32xf32> to vector<1x32xf32>
    %162 = vector.broadcast %161 : vector<1x32xf32> to vector<34x32xf32>
    %163 = arith.mulf %160, %162 : vector<34x32xf32>
    %164 = vector.shape_cast %8 : vector<32xf32> to vector<1x32xf32>
    %165 = vector.broadcast %164 : vector<1x32xf32> to vector<34x32xf32>
    %166 = arith.addf %163, %165 : vector<34x32xf32>
    %167 = arith.truncf %166 : vector<34x32xf32> to vector<34x32xbf16>
    %c0_52 = arith.constant 0 : index
    %c0_53 = arith.constant 0 : index
    %168 = vector.load %arg6[%c0_52, %c0_53] : memref<32x128xbf16, #tpu.memory_space<vmem>>, vector<32x128xbf16>
    %cst_54 = arith.constant dense<0.000000e+00> : vector<34x128xf32>
    %169 = tpu.matmul %167, %168, %cst_54 {dimension_numbers = #tpu.dot_dimension_numbers<[1], [0], [0], [1], [0, 0, 1, 1], [], []>} : vector<34x32xbf16>, vector<32x128xbf16>, vector<34x128xf32> -> vector<34x128xf32>
    %c0_55 = arith.constant 0 : index
    %c0_56 = arith.constant 0 : index
    %170 = vector.load %arg7[%c0_55, %c0_56] : memref<1x128xf32, #tpu.memory_space<vmem>>, vector<1x128xf32>
    %171 = vector.shape_cast %170 : vector<1x128xf32> to vector<128xf32>
    %172 = vector.shape_cast %171 : vector<128xf32> to vector<1x128xf32>
    %173 = vector.broadcast %172 : vector<1x128xf32> to vector<34x128xf32>
    %174 = arith.addf %169, %173 : vector<34x128xf32>
    %cst_57 = arith.constant 5.000000e-01 : f32
    %175 = vector.broadcast %cst_57 : f32 to vector<34x128xf32>
    %176 = arith.mulf %175, %174 : vector<34x128xf32>
    %cst_58 = arith.constant 0.707106769 : f32
    %177 = vector.broadcast %cst_58 : f32 to vector<34x128xf32>
    %178 = arith.mulf %174, %177 : vector<34x128xf32>
    %179 = math.erf %178 : vector<34x128xf32>
    %cst_59 = arith.constant 1.000000e+00 : f32
    %180 = vector.broadcast %cst_59 : f32 to vector<34x128xf32>
    %181 = arith.addf %180, %179 : vector<34x128xf32>
    %182 = arith.mulf %176, %181 : vector<34x128xf32>
    %183 = arith.truncf %182 : vector<34x128xf32> to vector<34x128xbf16>
    %c0_60 = arith.constant 0 : index
    %c0_61 = arith.constant 0 : index
    %184 = vector.load %arg8[%c0_60, %c0_61] : memref<128x32xbf16, #tpu.memory_space<vmem>>, vector<128x32xbf16>
    %cst_62 = arith.constant dense<0.000000e+00> : vector<34x32xf32>
    %185 = tpu.matmul %183, %184, %cst_62 {dimension_numbers = #tpu.dot_dimension_numbers<[1], [0], [0], [1], [0, 0, 1, 1], [], []>} : vector<34x128xbf16>, vector<128x32xbf16>, vector<34x32xf32> -> vector<34x32xf32>
    %186 = vector.shape_cast %12 : vector<32xf32> to vector<1x32xf32>
    %187 = vector.broadcast %186 : vector<1x32xf32> to vector<34x32xf32>
    %188 = arith.addf %185, %187 : vector<34x32xf32>
    %189 = vector.shape_cast %16 : vector<32xf32> to vector<1x32xf32>
    %190 = vector.broadcast %189 : vector<1x32xf32> to vector<34x32xf32>
    %191 = arith.mulf %190, %188 : vector<34x32xf32>
    %192 = arith.addf %144, %191 : vector<34x32xf32>
    %c0_63 = arith.constant 0 : index
    %c0_64 = arith.constant 0 : index
    %193 = vector.load %arg9[%c0_63, %c0_64] : memref<34x32xf32, #tpu.memory_space<vmem>>, vector<34x32xf32>
    tpu.vector_store %arg9[%c0_63, %c0_64], %192 {strides = array<i32>} : memref<34x32xf32, #tpu.memory_space<vmem>>, vector<34x32xf32>,
    return
  }
  func.func @transform_0(%arg0: i32) -> (i32, i32) {
    %c0_i32 = arith.constant 0 : i32
    %c0_i32_0 = arith.constant 0 : i32
    %c0_i32_1 = arith.constant 0 : i32
    return %c0_i32, %c0_i32_0 : i32, i32
  }
  func.func @transform_1(%arg0: i32) -> (i32, i32) {
    %c0_i32 = arith.constant 0 : i32
    %c0_i32_0 = arith.constant 0 : i32
    %c0_i32_1 = arith.constant 0 : i32
    return %c0_i32, %c0_i32_0 : i32, i32
  }
  func.func @transform_2(%arg0: i32) -> (i32, i32) {
    %c0_i32 = arith.constant 0 : i32
    %c0_i32_0 = arith.constant 0 : i32
    %c0_i32_1 = arith.constant 0 : i32
    return %c0_i32, %c0_i32_0 : i32, i32
  }
  func.func @transform_3(%arg0: i32) -> (i32, i32) {
    %c0_i32 = arith.constant 0 : i32
    %c0_i32_0 = arith.constant 0 : i32
    %c0_i32_1 = arith.constant 0 : i32
    return %c0_i32, %c0_i32_0 : i32, i32
  }
  func.func @transform_4(%arg0: i32) -> (i32, i32, i32) {
    %c0_i32 = arith.constant 0 : i32
    %c0_i32_0 = arith.constant 0 : i32
    %c0_i32_1 = arith.constant 0 : i32
    %c0_i32_2 = arith.constant 0 : i32
    return %c0_i32, %c0_i32_0, %c0_i32_1 : i32, i32, i32
  }
  func.func @transform_5(%arg0: i32) -> (i32, i32) {
    %c0_i32 = arith.constant 0 : i32
    %c0_i32_0 = arith.constant 0 : i32
    %c0_i32_1 = arith.constant 0 : i32
    return %c0_i32, %c0_i32_0 : i32, i32
  }
  func.func @transform_6(%arg0: i32) -> (i32, i32) {
    %c0_i32 = arith.constant 0 : i32
    %c0_i32_0 = arith.constant 0 : i32
    %c0_i32_1 = arith.constant 0 : i32
    return %c0_i32, %c0_i32_0 : i32, i32
  }
  func.func @transform_7(%arg0: i32) -> (i32, i32) {
    %c0_i32 = arith.constant 0 : i32
    %c0_i32_0 = arith.constant 0 : i32
    %c0_i32_1 = arith.constant 0 : i32
    return %c0_i32, %c0_i32_0 : i32, i32
  }
  func.func @transform_8(%arg0: i32) -> (i32, i32) {
    %c0_i32 = arith.constant 0 : i32
    %c0_i32_0 = arith.constant 0 : i32
    %c0_i32_1 = arith.constant 0 : i32
    return %c0_i32, %c0_i32_0 : i32, i32
  }
}

</mosaic_0001>

<bundles_post_ra>
// kernel: tpu_custom_call.1
= control target key start
LH: loop header
LB: loop body
LE: loop exit
PB: predicated region body
PF: predicated region fallthrough
CT: control target
= control target key end

     0   :  { %vm43_vm0 = vcmask 261120   ;;  %vm56_vm1 = vcmask 254976   ;;  %v1988_v39 = vmov 0   ;;  %s1990_s28 = smov 88   ;;  %vm1992_vm2 = vmmov 0   ;;  %s1993_s17 = smov 96   ;;  %s2676_s0 = inlined_call_operand.vmem [shape: f32[34,32], index: 0, kind: input, shape index: {}]   ;;  %s2677_s2 = inlined_call_operand.vmem [shape: bf16[32,192], index: 2, kind: input, shape index: {}]   ;;  %s2678_s1 = inlined_call_operand.vmem [shape: f32[8,32], index: 1, kind: input, shape index: {}]   ;;  %s2679_s3 = inlined_call_operand.vmem [shape: f32[1,192], index: 3, kind: input, shape index: {}]   ;;  %s2680_s4 = inlined_call_operand.vmem [shape: f32[4,34,34], index: 4, kind: input, shape index: {}]   ;;  %s2681_s5 = inlined_call_operand.vmem [shape: bf16[32,128], index: 5, kind: input, shape index: {}]   ;;  %s2682_s7 = inlined_call_operand.vmem [shape: bf16[128,32], index: 7, kind: input, shape index: {}]   ;;  %s2683_s6 = inlined_call_operand.vmem [shape: f32[1,128], index: 6, kind: input, shape index: {}]   ;;  %s2684_s8 = inlined_call_operand.vmem [shape: f32[34,32], index: 8, kind: output, shape index: {}]  }
   0x1   :  { %v30_v0 = vld [vmem:[%s2676_s0] sm:$0xff]  ;;  %v32_v1 = vld [vmem:[%s2676_s0 + $0x10] sm:$0xff]  ;;  %v31_v2 = vld [vmem:[%s2676_s0 + $0x8] sm:$0xff]  ;;  %209 = vmatprep.mubr.bf16.mxu1 %v1988_v39  ;;  %vm255_vm3 = vcmask 64512   ;;  %vm330_vm4 = vcmask 277504   ;;  %vm343_vm5 = vcmask 271360  }
   0x2   :  { %v44_v3 = vsel %vm43_vm0, %v30_v0, 0.0  ;;  %v50_v4 = vsel %vm43_vm0, %v32_v1, 0.0  ;;  %v33_v5 = vld [vmem:[%s2676_s0 + $0x18] sm:$0xff]  ;;  %v47_v6 = vsel %vm43_vm0, %v31_v2, 0.0  ;;  %v34_v8 = vld [vmem:[%s2676_s0 + $0x20] sm:$0x3] }
   0x3   :  { %45 = vadd.xlane.f32.xlu0 %v44_v3  ;;  %51 = vadd.xlane.f32.xlu1 %v50_v4  ;;  %v53_v7 = vsel %vm43_vm0, %v33_v5, 0.0  ;;  %v57_v9 = vsel %vm56_vm1, %v34_v8, 0.0  ;;  %v1857_v35 = vld [vmem:[%s2677_s2 + $0x4] ss:$8 sps:$4 sm:$0xff]   ;;  %v1859_v36 = vld [vmem:[%s2677_s2] ss:$8 sps:$4 sm:$0xff]  }
   0x4   :  { %177 = vmatprep.subr.bf16.mxu1 %v1857_v35  ;;  %v1860_v37 = vld [vmem:[%s2677_s2 + $0x14] ss:$8 sps:$4 sm:$0xff]   ;;  %v1862_v38 = vld [vmem:[%s2677_s2 + $0x10] ss:$8 sps:$4 sm:$0xff]   ;;  %v1525_v57 = vld [vmem:[%s2678_s1] ss:$0 sm:$0xff] }
   0x5   :  { %178 = vmatpush1.bf16.msra.mxu1 %v1859_v36  ;;  %v1526_v62 = vld [vmem:[%s2678_s1 + $0x1] ss:$0 sm:$0xff]  ;;  %s1994_s18 = smov 32   ;;  %vm557_vm6 = vcmask 1040384   ;;  %s1995_s19 = smov 80  }
   0x6   :  { %179 = vmatprep.subr.bf16.mxu1 %v1860_v37  ;;  %s1996_s20 = smov 112   ;;  %s1997_s21 = smov 72  }
   0x7   :  { %48 = vadd.xlane.f32.xlu0 %v47_v6  ;;  %54 = vadd.xlane.f32.xlu1 %v53_v7  ;;  %s1998_s22 = smov 104  }
   0x9   :  { %180 = vmatpush1.bf16.msra.mxu1 %v1862_v38 }
   0xb   :  { %58 = vadd.xlane.f32.xlu0 %v57_v9 }
  0x90   :  { %v46_v10 = vpop.xlane.xlu0 %45  ;;  %v52_v11 = vpop.xlane.xlu1 %51 }
  0x91   :  { %v61_v12 = vmul.f32 0.03125, %v46_v10  ;;  %v63_v13 = vmul.f32 0.03125, %v52_v11 }
  0x93   :  { %v66_v14 = vsub.f32 %v30_v0, %v61_v12  ;;  %v2065_v15 = vsub.f32 %v32_v1, %v63_v13 }
  0x94   :  { %v49_v16 = vpop.xlane.xlu0 %48  ;;  %v55_v17 = vpop.xlane.xlu1 %54 }
  0x95   :  { %v62_v18 = vmul.f32 0.03125, %v49_v16  ;;  %v64_v19 = vmul.f32 0.03125, %v55_v17  ;;  %v71_v20 = vmul.f32 %v66_v14, %v66_v14  ;;  %v73_v21 = vmul.f32 %v2065_v15, %v2065_v15 }
  0x96   :  { %v138_v16 = vlaneseq }
  0x97   :  { %v67_v22 = vsub.f32 %v31_v2, %v62_v18  ;;  %v69_v23 = vsub.f32 %v33_v5, %v64_v19  ;;  %v76_v24 = vsel %vm43_vm0, %v71_v20, 0.0  ;;  %v82_v27 = vsel %vm43_vm0, %v73_v21, 0.0  ;;  %v136_v20 = vld [vmem:[%s2679_s3] sm:$0x3]  ;;  %s1991_s3 = smov 120  }
  0x98   :  { %77 = vadd.xlane.f32.xlu1 %v76_v24  ;;  %v59_v25 = vpop.xlane.xlu0 %58  ;;  %v139_v17 = vshrl.u32 %v138_v16, 7  ;;  %v1989_v18 = vmov 0.0  }
  0x99   :  { %v65_v26 = vmul.f32 0.03125, %v59_v25  ;;  %v72_v28 = vmul.f32 %v67_v22, %v67_v22  ;;  %v74_v29 = vmul.f32 %v69_v23, %v69_v23  ;;  %1675 = vmatprep.subr.bf16.mxu0 %v1989_v18  ;;  %1657 = vmatprep.subr.bf16.mxu1 %v1989_v18 }
  0x9a   :  { %v140_v19 = vsub.s32 0, %v139_v17  ;;  %v144_v21 = vsub.s32 1, %v139_v17  ;;  %1681 = vmatprep.mubr.msk.bf16.mxu0 %vm1992_vm2, %v1989_v18 }
  0x9b   :  { %v70_v30 = vsub.f32 %v34_v8, %v65_v26  ;;  %v79_v31 = vsel %vm43_vm0, %v72_v28, 0.0  ;;  %v85_v32 = vsel %vm43_vm0, %v74_v29, 0.0 }
  0x9c   :  { %83 = vadd.xlane.f32.xlu1 %v82_v27  ;;  %80 = vadd.xlane.f32.xlu0 %v79_v31  ;;  %v2101_v24 = vrot.slane %v136_v20, %v144_v21 }
  0x9d   :  { %v75_v33 = vmul.f32 %v70_v30, %v70_v30 }
  0x9f   :  { %v88_v34 = vsel %vm56_vm1, %v75_v33, 0.0 }
  0xa0   :  { %86 = vadd.xlane.f32.xlu0 %v85_v32  ;;  %89 = vadd.xlane.f32.xlu1 %v88_v34 }
 0x125   :  { %v78_v40 = vpop.xlane.xlu1 %77 }
 0x126   :  { %v91_v41 = vmul.f32 0.03125, %v78_v40 }
 0x128   :  { %v96_v42 = vadd.f32 1e-05, %v91_v41 }
 0x129   :  { %v84_v43 = vpop.xlane.xlu1 %83  ;;  %v81_v44 = vpop.xlane.xlu0 %80 }
 0x12a   :  { %1873 = vrsqrt.f32 %v96_v42  ;;  %v93_v45 = vmul.f32 0.03125, %v84_v43  ;;  %v92_v46 = vmul.f32 0.03125, %v81_v44 }
 0x12c   :  { %v97_v47 = vadd.f32 1e-05, %v92_v46  ;;  %v98_v48 = vadd.f32 1e-05, %v93_v45 }
 0x12d   :  { %v90_v49 = vpop.xlane.xlu1 %89  ;;  %v87_v50 = vpop.xlane.xlu0 %86 }
 0x12e   :  { %v94_v51 = vmul.f32 0.03125, %v87_v50  ;;  %1875 = vrsqrt.f32 %v97_v47  ;;  %v95_v52 = vmul.f32 0.03125, %v90_v49 }
 0x12f   :  { %1877 = vrsqrt.f32 %v98_v48 }
 0x130   :  { %v99_v53 = vadd.f32 1e-05, %v94_v51  ;;  %v100_v54 = vadd.f32 1e-05, %v95_v52 }
 0x132   :  { %1879 = vrsqrt.f32 %v99_v53 }
 0x133   :  { %1881 = vrsqrt.f32 %v100_v54 }
 0x134   :  { %v1874_v55 = vpop.eup %1873 }
 0x135   :  { %v106_v56 = vmul.f32 %v1874_v55, %v66_v14 }
 0x137   :  { %v115_v60 = vmul.f32 %v1525_v57, %v106_v56 }
 0x138   :  { %v1876_v58 = vpop.eup %1875 }
 0x139   :  { %v107_v59 = vmul.f32 %v1876_v58, %v67_v22  ;;  %v1878_v61 = vpop.eup %1877  ;;  %v124_v3 = vadd.f32 %v1526_v62, %v115_v60  ;;  %v141_v22 = vrot.slane %v136_v20, %v140_v19 }
 0x13a   :  { %v108_v1 = vmul.f32 %v1878_v61, %v2065_v15  ;;  %v1538_v61 = vld [vmem:[%s2680_s4 + $0x30] sm:$0xff] }
 0x13b   :  { %v116_v63 = vmul.f32 %v1525_v57, %v107_v59  ;;  %v1537_v59 = vld [vmem:[%s2680_s4 + $0x28] sm:$0xff] }
 0x13c   :  { %v1880_v0 = vpop.eup %1879  ;;  %v117_v8 = vmul.f32 %v1525_v57, %v108_v1 }
 0x13d   :  { %v109_v2 = vmul.f32 %v1880_v0, %v69_v23  ;;  %v125_v4 = vadd.f32 %v1526_v62, %v116_v63  ;;  %v1882_v7 = vpop.eup %1881 }
 0x13e   :  { %v110_v10 = vmul.f32 %v1882_v7, %v70_v30  ;;  %v126_v11 = vadd.f32 %v1526_v62, %v117_v8  ;;  %v1540_v7 = vld [vmem:[%s2680_s4 + $0x40] sm:$0xff] }
 0x13f   :  { %v129_v5 = vpack.c.bf16 %v125_v4, %v124_v3  ;;  %v118_v6 = vmul.f32 %v1525_v57, %v109_v2 }
 0x140   :  { %v119_v13 = vmul.f32 %v1525_v57, %v110_v10 }
 0x141   :  { %1531 = vmatmul.mubr.msk.bf16.vlgmr.msra.gmra.mrb[0].mxu1 %vm43_vm0, %v129_v5  ;;  %v127_v9 = vadd.f32 %v1526_v62, %v118_v6  ;;  %v1539_v5 = vld [vmem:[%s2680_s4 + $0x38] sm:$0xff] }
 0x142   :  { %219 = vmatprep.mubr.bf16.mxu1 %v1988_v39  ;;  %v128_v14 = vadd.f32 %v1526_v62, %v119_v13 }
 0x143   :  { %v130_v12 = vpack.c.bf16 %v127_v9, %v126_v11 }
 0x144   :  { %v131_v15 = vpack.c.bf16 %v128_v14, %v128_v14  ;;  %v1541_v14 = vld [vmem:[%s2680_s4 + $0x48] sm:$0x3] }
 0x149   :  { %1532 = vmatmul.mubr.msk.bf16.gmra.mrb[4].mxu1 %vm43_vm0, %v130_v12 }
 0x14a   :  { %229 = vmatprep.mubr.bf16.mxu1 %v1988_v39 }
 0x151   :  { %1533 = vmatmul.mubr.msk.bf16.gmra.mrb[8].mxu1 %vm43_vm0, %v131_v15 }
 0x152   :  { %1663 = vmatprep.mubr.msk.bf16.mxu1 %vm1992_vm2, %v1989_v18 }
 0x214   :  { %v211_v23 = vpop.f32.mrb[0].mxu1 }
 0x215   :  { %v213_v25 = vpop.f32.mrb[1].mxu1  ;;  %v212_v27 = vadd.f32 %v211_v23, %v141_v22 }
 0x216   :  { %v215_v26 = vpop.f32.mrb[2].mxu1  ;;  %v214_v30 = vadd.f32 %v213_v25, %v2101_v24 }
 0x217   :  { %v216_v28 = vadd.f32 %v215_v26, %v141_v22  ;;  %v217_v29 = vpop.f32.mrb[3].mxu1 }
 0x218   :  { %v218_v31 = vadd.f32 %v217_v29, %v2101_v24 }
 0x219   :  { %v2105_v32 = vpack.c.bf16 %v216_v28, %v212_v27 }
 0x21a   :  { %v2107_v33 = vpack.c.bf16 %v218_v31, %v214_v30 }
 0x21b   :  { %402 = vrot.lane.b32.xlu0 %v2105_v32, %s1990_s28 }
 0x21c   :  { %v221_v34 = vpop.f32.mrb[4].mxu1 }
 0x21d   :  { %v223_v35 = vpop.f32.mrb[5].mxu1  ;;  %v222_v37 = vadd.f32 %v221_v34, %v141_v22 }
 0x21e   :  { %v225_v36 = vpop.f32.mrb[6].mxu1  ;;  %v224_v40 = vadd.f32 %v223_v35, %v2101_v24 }
 0x21f   :  { %v226_v38 = vadd.f32 %v225_v36, %v141_v22  ;;  %v227_v39 = vpop.f32.mrb[7].mxu1 }
 0x220   :  { %v228_v41 = vadd.f32 %v227_v39, %v2101_v24 }
 0x221   :  { %v2112_v42 = vpack.c.bf16 %v226_v38, %v222_v37 }
 0x222   :  { %v2114_v43 = vpack.c.bf16 %v228_v41, %v224_v40 }
 0x223   :  { %398 = vrot.lane.b32.xlu0 %v2112_v42, %s1991_s3  ;;  %404 = vrot.lane.b32.xlu1 %v2112_v42, %s1990_s28 }
 0x224   :  { %v231_v44 = vpop.f32.mrb[8].mxu1 }
 0x225   :  { %v232_v45 = vadd.f32 %v231_v44, %v141_v22  ;;  %v2122_v46 = vpop.f32.mrb[9].mxu1 }
 0x226   :  { %v235_v47 = vpop.f32.mrb[10].mxu1 }
 0x227   :  { %v2124_v48 = vpack.c.bf16 %v232_v45, %v232_v45  ;;  %v236_v49 = vpop.f32.mrb[11].mxu1 }
 0x229   :  { %406 = vrot.lane.b32.xlu1 %v2124_v48, %s1990_s28 }
 0x22d   :  { %396 = vrot.lane.b32.xlu1 %v2105_v32, %s1991_s3 }
 0x231   :  { %400 = vrot.lane.b32.xlu1 %v2124_v48, %s1991_s3  ;;  %s1999_s3 = smov 64  }
 0x28d   :  { %v403_v50 = vpop.permute.xlu0 %402 }
 0x28e   :  { %v418_v51 = vsel %vm255_vm3, %v403_v50, 0 }
 0x28f   :  { %1676 = vmatpush3.bf16.xpose.msra.mxu0 %v418_v51 }
 0x290   :  { %1677 = vmatprep.subr.bf16.mxu0 %v1989_v18 }
 0x295   :  { %v405_v52 = vpop.permute.xlu1 %404  ;;  %v399_v57 = vpop.permute.xlu0 %398 }
 0x296   :  { %v421_v53 = vsel %vm255_vm3, %v405_v52, 0 }
 0x297   :  { %1678 = vmatpush3.bf16.xpose.msra.mxu0 %v421_v53 }
 0x298   :  { %1679 = vmatprep.subr.bf16.mxu0 %v1989_v18 }
 0x29b   :  { %v407_v54 = vpop.permute.xlu1 %406 }
 0x29c   :  { %v424_v55 = vsel %vm255_vm3, %v407_v54, 0 }
 0x29f   :  { %1680 = vmatpush3.bf16.xpose.msra.mxu0 %v424_v55  ;;  %v397_v56 = vpop.permute.xlu1 %396 }
 0x2a0   :  { %1711 = vmatprep.subr.bf16.mxu0 %v1989_v18 }
 0x2a3   :  { %v401_v58 = vpop.permute.xlu1 %400 }
 0x2a6   :  { %1682 = vmatmul.mubr.msk.bf16.vlgmr.msra.gmra.mrb[0].mxu0 %vm255_vm3, %v397_v56 }
 0x2a7   :  { %1685 = vmatprep.mubr.msk.bf16.mxu0 %vm1992_vm2, %v1989_v18 }
 0x2ae   :  { %1686 = vmatmul.mubr.msk.bf16.gmra.mrb[4].mxu0 %vm255_vm3, %v399_v57 }
 0x2af   :  { %1689 = vmatprep.mubr.msk.bf16.mxu0 %vm1992_vm2, %v1989_v18 }
 0x2b6   :  { %1690 = vmatmul.mubr.msk.bf16.gmra.mrb[8].mxu0 %vm255_vm3, %v401_v58 }
 0x2b7   :  { %1717 = vmatprep.mubr.msk.bf16.mxu0 %vm1992_vm2, %v1989_v18 }
 0x379   :  { %v460_v60 = vpop.f32.mrb[0].mxu0 }
 0x37a   :  { %v461_v62 = vadd.f32 %v1537_v59, %v460_v60  ;;  %v1683_v63 = vpop.f32.mrb[1].mxu0 }
 0x37b   :  { %v463_v0 = vpop.f32.mrb[2].mxu0 }
 0x37c   :  { %v464_v1 = vadd.f32 %v1538_v61, %v463_v0  ;;  %v1684_v2 = vpop.f32.mrb[3].mxu0  ;;  %v482_v3 = vsel %vm330_vm4, %v461_v62, -inf }
 0x37d   :  { %483 = vmax.xlane.f32.xlu0 %v482_v3 }
 0x37e   :  { %v485_v4 = vsel %vm330_vm4, %v464_v1, -inf }
 0x37f   :  { %486 = vmax.xlane.f32.xlu1 %v485_v4 }
 0x381   :  { %v468_v6 = vpop.f32.mrb[4].mxu0 }
 0x382   :  { %v469_v8 = vadd.f32 %v1539_v5, %v468_v6  ;;  %v1687_v9 = vpop.f32.mrb[5].mxu0 }
 0x383   :  { %v471_v10 = vpop.f32.mrb[6].mxu0 }
 0x384   :  { %v472_v11 = vadd.f32 %v1540_v7, %v471_v10  ;;  %v1688_v12 = vpop.f32.mrb[7].mxu0  ;;  %v488_v13 = vsel %vm330_vm4, %v469_v8, -inf }
 0x385   :  { %489 = vmax.xlane.f32.xlu0 %v488_v13 }
 0x386   :  { %v491_v15 = vsel %vm330_vm4, %v472_v11, -inf }
 0x389   :  { %492 = vmax.xlane.f32.xlu0 %v491_v15  ;;  %v476_v16 = vpop.f32.mrb[8].mxu0 }
 0x38a   :  { %v477_v17 = vadd.f32 %v1541_v14, %v476_v16  ;;  %v1691_v19 = vpop.f32.mrb[9].mxu0 }
 0x38b   :  { %v479_v20 = vpop.f32.mrb[10].mxu0 }
 0x38c   :  { %v1692_v21 = vpop.f32.mrb[11].mxu0  ;;  %v494_v22 = vsel %vm343_vm5, %v477_v17, -inf }
 0x38d   :  { %495 = vmax.xlane.f32.xlu0 %v494_v22 }
 0x390   :  { %249 = vrot.lane.b32.xlu1 %v2105_v32, %s1993_s17 }
 0x394   :  { %253 = vrot.lane.b32.xlu1 %v2124_v48, %s1993_s17 }
 0x398   :  { %542 = vrot.lane.b32.xlu1 %v2112_v42, %s1994_s18 }
 0x39c   :  { %544 = vrot.lane.b32.xlu1 %v2124_v48, %s1994_s18 }
 0x3a3   :  { %251 = vrot.lane.b32.xlu0 %v2112_v42, %s1993_s17 }
 0x3a7   :  { %540 = vrot.lane.b32.xlu0 %v2105_v32, %s1994_s18 }
 0x40a   :  { %v484_v23 = vpop.xlane.xlu0 %483 }
 0x40b   :  { %v497_v25 = vsub.f32 %v461_v62, %v484_v23 }
 0x40c   :  { %v487_v26 = vpop.xlane.xlu1 %486 }
 0x40d   :  { %v502_v27 = vmul.f32 1.442695, %v497_v25  ;;  %v498_v28 = vsub.f32 %v464_v1, %v487_v26 }
 0x40f   :  { %1883 = vpow2.f32 %v502_v27  ;;  %v504_v29 = vmul.f32 1.442695, %v498_v28 }
 0x410   :  { %v250_v30 = vpop.permute.xlu1 %249 }
 0x411   :  { %1885 = vpow2.f32 %v504_v29  ;;  %v266_v31 = vsel %vm255_vm3, %v250_v30, 0 }
 0x412   :  { %1658 = vmatpush3.bf16.xpose.msra.mxu1 %v266_v31  ;;  %v490_v34 = vpop.xlane.xlu0 %489 }
 0x413   :  { %v499_v35 = vsub.f32 %v469_v8, %v490_v34  ;;  %1659 = vmatprep.subr.bf16.mxu1 %v1989_v18 }
 0x414   :  { %v254_v55 = vpop.permute.xlu1 %253 }
 0x415   :  { %v506_v36 = vmul.f32 1.442695, %v499_v35  ;;  %v272_v58 = vsel %vm255_vm3, %v254_v55, 0  ;;  %v243_v55 = vld [vmem:[%s2680_s4 + $0x10] sm:$0xff] }
 0x416   :  { %v493_v37 = vpop.xlane.xlu0 %492 }
 0x417   :  { %1887 = vpow2.f32 %v506_v36  ;;  %v500_v38 = vsub.f32 %v472_v11, %v493_v37 }
 0x418   :  { %v543_v61 = vpop.permute.xlu1 %542 }
 0x419   :  { %v2175_v39 = vpop.eup %1883  ;;  %v508_v40 = vmul.f32 1.442695, %v500_v38 }
 0x41a   :  { %v496_v41 = vpop.xlane.xlu0 %495  ;;  %v512_v44 = vsel %vm330_vm4, %v2175_v39, 0.0 }
 0x41b   :  { %v2179_v45 = vpop.eup %1885  ;;  %1889 = vpow2.f32 %v508_v40  ;;  %v501_v47 = vsub.f32 %v477_v17, %v496_v41  ;;  %513 = vadd.xlane.f32.xlu1 %v512_v44  ;;  %v241_v41 = vld [vmem:[%s2680_s4] sm:$0xff] }
 0x41c   :  { %v515_v49 = vsel %vm330_vm4, %v2179_v45, 0.0  ;;  %v545_v63 = vpop.permute.xlu1 %544 }
 0x41d   :  { %v510_v50 = vmul.f32 1.442695, %v501_v47  ;;  %516 = vadd.xlane.f32.xlu0 %v515_v49  ;;  %v559_v0 = vsel %vm557_vm6, %v545_v63, 0 }
 0x41e   :  { %v252_v51 = vpop.permute.xlu0 %251 }
 0x41f   :  { %1891 = vpow2.f32 %v510_v50  ;;  %v269_v52 = vsel %vm255_vm3, %v252_v51, 0 }
 0x420   :  { %1660 = vmatpush3.bf16.xpose.msra.mxu1 %v269_v52 }
 0x421   :  { %v2184_v53 = vpop.eup %1887  ;;  %1661 = vmatprep.subr.bf16.mxu1 %v1989_v18 }
 0x422   :  { %v518_v54 = vsel %vm330_vm4, %v2184_v53, 0.0  ;;  %v541_v62 = vpop.permute.xlu0 %540 }
 0x423   :  { %519 = vadd.xlane.f32.xlu0 %v518_v54 }
 0x425   :  { %v2189_v56 = vpop.eup %1889 }
 0x426   :  { %v521_v57 = vsel %vm330_vm4, %v2189_v56, 0.0 }
 0x427   :  { %522 = vadd.xlane.f32.xlu1 %v521_v57  ;;  %v244_v57 = vld [vmem:[%s2680_s4 + $0x18] sm:$0xff] }
 0x428   :  { %1662 = vmatpush3.bf16.xpose.msra.mxu1 %v272_v58 }
 0x429   :  { %v2194_v59 = vpop.eup %1891  ;;  %1693 = vmatprep.subr.bf16.mxu1 %v1989_v18 }
 0x42a   :  { %v524_v60 = vsel %vm343_vm5, %v2194_v59, 0.0 }
 0x42b   :  { %525 = vadd.xlane.f32.xlu1 %v524_v60 }
 0x42f   :  { %1664 = vmatmul.mubr.msk.bf16.vlgmr.msra.gmra.mrb[12].mxu1 %vm255_vm3, %v2105_v32 }
 0x430   :  { %1694 = vmatpush3.bf16.msra.mxu1 %v541_v62  ;;  %1667 = vmatprep.mubr.msk.bf16.mxu1 %vm1992_vm2, %v1989_v18 }
 0x431   :  { %1695 = vmatprep.subr.bf16.mxu1 %v1989_v18 }
 0x434   :  { %1696 = vmatpush3.bf16.msra.mxu1 %v543_v61 }
 0x435   :  { %1697 = vmatprep.subr.bf16.mxu1 %v1989_v18 }
 0x437   :  { %1668 = vmatmul.mubr.msk.bf16.gmra.mrb[16].mxu1 %vm255_vm3, %v2112_v42 }
 0x438   :  { %1698 = vmatpush3.bf16.msra.mxu1 %v559_v0  ;;  %1671 = vmatprep.mubr.msk.bf16.mxu1 %vm1992_vm2, %v1989_v18  ;;  %v245_v0 = vld [vmem:[%s2680_s4 + $0x20] sm:$0x3] }
 0x439   :  { %705 = vrot.lane.b32.xlu0 %v2105_v32, %s1995_s19  ;;  %1729 = vmatprep.subr.bf16.mxu1 %v1989_v18 }
 0x43c   :  { %707 = vrot.lane.b32.xlu1 %v2112_v42, %s1995_s19 }
 0x43d   :  { %709 = vrot.lane.b32.xlu0 %v2124_v48, %s1995_s19 }
 0x43f   :  { %1672 = vmatmul.mubr.msk.bf16.gmra.mrb[20].mxu1 %vm255_vm3, %v2124_v48 }
 0x440   :  { %699 = vrot.lane.b32.xlu1 %v2105_v32, %s1996_s20  ;;  %1699 = vmatprep.mubr.msk.bf16.mxu1 %vm1992_vm2, %v1989_v18 }
 0x441   :  { %931 = vrot.lane.b32.xlu0 %v2105_v32, %s1997_s21 }
 0x444   :  { %701 = vrot.lane.b32.xlu1 %v2112_v42, %s1996_s20 }
 0x445   :  { %933 = vrot.lane.b32.xlu0 %v2112_v42, %s1997_s21 }
 0x448   :  { %703 = vrot.lane.b32.xlu1 %v2124_v48, %s1996_s20 }
 0x449   :  { %935 = vrot.lane.b32.xlu0 %v2124_v48, %s1997_s21 }
 0x44c   :  { %925 = vrot.lane.b32.xlu1 %v2105_v32, %s1998_s22 }
 0x44d   :  { %927 = vrot.lane.b32.xlu0 %v2112_v42, %s1998_s22 }
 0x450   :  { %929 = vrot.lane.b32.xlu1 %v2124_v48, %s1998_s22 }
 0x4a8   :  { %v514_v1 = vpop.xlane.xlu1 %513 }
 0x4a9   :  { %1893 = vrcp.f32 %v514_v1 }
 0x4aa   :  { %v517_v2 = vpop.xlane.xlu0 %516 }
 0x4ab   :  { %1895 = vrcp.f32 %v517_v2 }
 0x4b0   :  { %v520_v3 = vpop.xlane.xlu0 %519 }
 0x4b1   :  { %1897 = vrcp.f32 %v520_v3 }
 0x4b3   :  { %v1894_v4 = vpop.eup %1893 }
 0x4b4   :  { %v523_v5 = vpop.xlane.xlu1 %522  ;;  %v532_v7 = vmul.f32 %v1894_v4, %v2175_v39  ;;  %v706_v9 = vpop.permute.xlu0 %705 }
 0x4b5   :  { %v1896_v6 = vpop.eup %1895  ;;  %1899 = vrcp.f32 %v523_v5  ;;  %v721_v12 = vsel %vm255_vm3, %v706_v9, 0 }
 0x4b6   :  { %v533_v8 = vmul.f32 %v1896_v6, %v2179_v45  ;;  %v242_v45 = vld [vmem:[%s2680_s4 + $0x8] sm:$0xff] }
 0x4b8   :  { %v537_v10 = vpack.c.bf16 %v533_v8, %v532_v7  ;;  %v526_v11 = vpop.xlane.xlu1 %525  ;;  %v710_v23 = vpop.permute.xlu0 %709 }
 0x4b9   :  { %1901 = vrcp.f32 %v526_v11  ;;  %v727_v25 = vsel %vm255_vm3, %v710_v23, 0 }
 0x4ba   :  { %1700 = vmatmul.mubr.msk.bf16.vlgmr.msra.gmra.mrb[24].mxu1 %vm330_vm4, %v537_v10 }
 0x4bb   :  { %1730 = vmatpush3.bf16.xpose.msra.mxu1 %v721_v12  ;;  %1703 = vmatprep.mubr.msk.bf16.mxu1 %vm1992_vm2, %v1989_v18  ;;  %v1898_v13 = vpop.eup %1897 }
 0x4bc   :  { %1731 = vmatprep.subr.bf16.mxu1 %v1989_v18  ;;  %v708_v15 = vpop.permute.xlu1 %707  ;;  %v534_v16 = vmul.f32 %v1898_v13, %v2184_v53  ;;  %v932_v27 = vpop.permute.xlu0 %931 }
 0x4bd   :  { %v724_v19 = vsel %vm255_vm3, %v708_v15, 0  ;;  %v947_v29 = vsel %vm255_vm3, %v932_v27, 0 }
 0x4bf   :  { %v1900_v14 = vpop.eup %1899 }
 0x4c0   :  { %v535_v17 = vmul.f32 %v1900_v14, %v2189_v56  ;;  %v700_v28 = vpop.permute.xlu1 %699  ;;  %v934_v30 = vpop.permute.xlu0 %933 }
 0x4c1   :  { %v950_v34 = vsel %vm255_vm3, %v934_v30, 0 }
 0x4c2   :  { %v538_v20 = vpack.c.bf16 %v535_v17, %v534_v16 }
 0x4c3   :  { %v1902_v21 = vpop.eup %1901  ;;  %1732 = vmatpush3.bf16.xpose.msra.mxu1 %v724_v19 }
 0x4c4   :  { %1704 = vmatmul.mubr.msk.bf16.gmra.mrb[28].mxu1 %vm330_vm4, %v538_v20  ;;  %1733 = vmatprep.subr.bf16.mxu1 %v1989_v18  ;;  %v536_v22 = vmul.f32 %v1902_v21, %v2194_v59  ;;  %v702_v31 = vpop.permute.xlu1 %701  ;;  %v936_v35 = vpop.permute.xlu0 %935 }
 0x4c5   :  { %1707 = vmatprep.mubr.msk.bf16.mxu1 %vm1992_vm2, %v1989_v18  ;;  %v953_v37 = vsel %vm255_vm3, %v936_v35, 0 }
 0x4c6   :  { %v539_v26 = vpack.c.bf16 %v536_v22, %v536_v22 }
 0x4c8   :  { %v704_v36 = vpop.permute.xlu1 %703  ;;  %v928_v39 = vpop.permute.xlu0 %927 }
 0x4cb   :  { %1734 = vmatpush3.bf16.xpose.msra.mxu1 %v727_v25 }
 0x4cc   :  { %1708 = vmatmul.mubr.msk.bf16.gmra.mrb[32].mxu1 %vm330_vm4, %v539_v26  ;;  %1765 = vmatprep.subr.bf16.mxu1 %v1989_v18  ;;  %v926_v38 = vpop.permute.xlu1 %925 }
 0x4cd   :  { %1735 = vmatprep.mubr.msk.bf16.mxu1 %vm1992_vm2, %v1989_v18 }
 0x4d0   :  { %v930_v40 = vpop.permute.xlu1 %929 }
 0x4d4   :  { %1736 = vmatmul.mubr.msk.bf16.vlgmr.msra.gmra.mrb[36].mxu1 %vm255_vm3, %v700_v28 }
 0x4d5   :  { %1766 = vmatpush3.bf16.xpose.msra.mxu1 %v947_v29  ;;  %1739 = vmatprep.mubr.msk.bf16.mxu1 %vm1992_vm2, %v1989_v18 }
 0x4d6   :  { %1767 = vmatprep.subr.bf16.mxu1 %v1989_v18 }
 0x4dc   :  { %1740 = vmatmul.mubr.msk.bf16.gmra.mrb[40].mxu1 %vm255_vm3, %v702_v31 }
 0x4dd   :  { %1768 = vmatpush3.bf16.xpose.msra.mxu1 %v950_v34  ;;  %1743 = vmatprep.mubr.msk.bf16.mxu1 %vm1992_vm2, %v1989_v18 }
 0x4de   :  { %1769 = vmatprep.subr.bf16.mxu1 %v1989_v18 }
 0x4e4   :  { %1744 = vmatmul.mubr.msk.bf16.gmra.mrb[44].mxu1 %vm255_vm3, %v704_v36 }
 0x4e5   :  { %1770 = vmatpush3.bf16.xpose.msra.mxu1 %v953_v37  ;;  %1771 = vmatprep.mubr.msk.bf16.mxu1 %vm1992_vm2, %v1989_v18 }
 0x4e6   :  { %1801 = vmatprep.subr.bf16.mxu1 %v1989_v18 }
 0x4ec   :  { %1772 = vmatmul.mubr.msk.bf16.vlgmr.msra.gmra.mrb[48].mxu1 %vm255_vm3, %v926_v38 }
 0x4ed   :  { %1775 = vmatprep.mubr.msk.bf16.mxu1 %vm1992_vm2, %v1989_v18 }
 0x4f4   :  { %1776 = vmatmul.mubr.msk.bf16.gmra.mrb[52].mxu1 %vm255_vm3, %v928_v39 }
 0x4f5   :  { %1779 = vmatprep.mubr.msk.bf16.mxu1 %vm1992_vm2, %v1989_v18 }
 0x4fc   :  { %1780 = vmatmul.mubr.msk.bf16.gmra.mrb[56].mxu1 %vm255_vm3, %v930_v40 }
 0x4fd   :  { %1805 = vmatprep.mubr.msk.bf16.mxu1 %vm1992_vm2, %v1989_v18 }
 0x502   :  { %v308_v44 = vpop.f32.mrb[12].mxu1 }
 0x503   :  { %v309_v47 = vadd.f32 %v308_v44, %v241_v41  ;;  %v1665_v49 = vpop.f32.mrb[13].mxu1 }
 0x504   :  { %v311_v50 = vpop.f32.mrb[14].mxu1 }
 0x505   :  { %v312_v51 = vadd.f32 %v311_v50, %v242_v45  ;;  %v1666_v52 = vpop.f32.mrb[15].mxu1  ;;  %v331_v53 = vsel %vm330_vm4, %v309_v47, -inf }
 0x506   :  { %332 = vmax.xlane.f32.xlu0 %v331_v53  ;;  %v1552_v53 = vld [vmem:[%s2680_s4 + $0x58] sm:$0xff] }
 0x507   :  { %v334_v54 = vsel %vm330_vm4, %v312_v51, -inf }
 0x508   :  { %335 = vmax.xlane.f32.xlu1 %v334_v54 }
 0x50a   :  { %v316_v56 = vpop.f32.mrb[16].mxu1 }
 0x50b   :  { %v317_v58 = vadd.f32 %v316_v56, %v243_v55  ;;  %v1669_v59 = vpop.f32.mrb[17].mxu1 }
 0x50c   :  { %v319_v60 = vpop.f32.mrb[18].mxu1 }
 0x50d   :  { %v320_v61 = vadd.f32 %v319_v60, %v244_v57  ;;  %v1670_v62 = vpop.f32.mrb[19].mxu1  ;;  %v337_v63 = vsel %vm330_vm4, %v317_v58, -inf  ;;  %v1554_v60 = vld [vmem:[%s2680_s4 + $0x68] sm:$0xff] }
 0x50e   :  { %338 = vmax.xlane.f32.xlu0 %v337_v63 }
 0x50f   :  { %v340_v1 = vsel %vm330_vm4, %v320_v61, -inf }
 0x512   :  { %341 = vmax.xlane.f32.xlu0 %v340_v1  ;;  %v324_v2 = vpop.f32.mrb[20].mxu1 }
 0x513   :  { %v325_v3 = vadd.f32 %v324_v2, %v245_v0  ;;  %v1673_v4 = vpop.f32.mrb[21].mxu1 }
 0x514   :  { %v327_v5 = vpop.f32.mrb[22].mxu1  ;;  %v1553_v4 = vld [vmem:[%s2680_s4 + $0x60] sm:$0xff] }
 0x515   :  { %v1674_v6 = vpop.f32.mrb[23].mxu1  ;;  %v344_v7 = vsel %vm343_vm5, %v325_v3, -inf }
 0x516   :  { %345 = vmax.xlane.f32.xlu0 %v344_v7 }
 0x58d   :  { %v2291_v8 = vpop.f32.mrb[24].mxu1 }
 0x58e   :  { %v1701_v9 = vpop.f32.mrb[25].mxu1 }
 0x58f   :  { %v2293_v10 = vpop.f32.mrb[26].mxu1 }
 0x590   :  { %v1702_v11 = vpop.f32.mrb[27].mxu1 }
 0x591   :  { %v1555_v11 = vld [vmem:[%s2680_s4 + $0x70] sm:$0x3] }
 0x593   :  { %v333_v12 = vpop.xlane.xlu0 %332 }
 0x594   :  { %v347_v13 = vsub.f32 %v309_v47, %v333_v12 }
 0x595   :  { %v336_v14 = vpop.xlane.xlu1 %335 }
 0x596   :  { %v352_v15 = vmul.f32 1.442695, %v347_v13  ;;  %v348_v16 = vsub.f32 %v312_v51, %v336_v14 }
 0x597   :  { %v2295_v17 = vpop.f32.mrb[28].mxu1 }
 0x598   :  { %1903 = vpow2.f32 %v352_v15  ;;  %v354_v19 = vmul.f32 1.442695, %v348_v16  ;;  %v1705_v20 = vpop.f32.mrb[29].mxu1 }
 0x599   :  { %v2297_v21 = vpop.f32.mrb[30].mxu1 }
 0x59a   :  { %1905 = vpow2.f32 %v354_v19  ;;  %v1706_v22 = vpop.f32.mrb[31].mxu1  ;;  %v1562_v19 = vld [vmem:[%s2680_s4 + $0x78] sm:$0xff] }
 0x59b   :  { %v339_v23 = vpop.xlane.xlu0 %338 }
 0x59c   :  { %v349_v25 = vsub.f32 %v317_v58, %v339_v23  ;;  %v1551_v58 = vld [vmem:[%s2680_s4 + $0x50] sm:$0xff]  ;;  %v1563_v23 = vld [vmem:[%s2680_s4 + $0x80] sm:$0xff] }
 0x59e   :  { %v356_v26 = vmul.f32 1.442695, %v349_v25 }
 0x59f   :  { %v2299_v27 = vpop.f32.mrb[32].mxu1  ;;  %v342_v28 = vpop.xlane.xlu0 %341 }
 0x5a0   :  { %1907 = vpow2.f32 %v356_v26  ;;  %v350_v29 = vsub.f32 %v320_v61, %v342_v28  ;;  %v1709_v30 = vpop.f32.mrb[33].mxu1 }
 0x5a1   :  { %v614_v31 = vpop.f32.mrb[34].mxu1 }
 0x5a2   :  { %v2301_v34 = vpop.eup %1903  ;;  %v358_v35 = vmul.f32 1.442695, %v350_v29  ;;  %v1710_v36 = vpop.f32.mrb[35].mxu1 }
 0x5a3   :  { %v346_v37 = vpop.xlane.xlu0 %345  ;;  %v362_v38 = vsel %vm330_vm4, %v2301_v34, 0.0  ;;  %v1564_v36 = vld [vmem:[%s2680_s4 + $0x88] sm:$0xff] }
 0x5a4   :  { %v2305_v39 = vpop.eup %1905  ;;  %1909 = vpow2.f32 %v358_v35  ;;  %v351_v40 = vsub.f32 %v325_v3, %v346_v37  ;;  %363 = vadd.xlane.f32.xlu1 %v362_v38  ;;  %v1565_v38 = vld [vmem:[%s2680_s4 + $0x90] sm:$0xff] }
 0x5a5   :  { %v365_v41 = vsel %vm330_vm4, %v2305_v39, 0.0 }
 0x5a6   :  { %v360_v44 = vmul.f32 1.442695, %v351_v40  ;;  %366 = vadd.xlane.f32.xlu0 %v365_v41 }
 0x5a7   :  { %v763_v45 = vpop.f32.mrb[36].mxu1 }
 0x5a8   :  { %1911 = vpow2.f32 %v360_v44  ;;  %v1737_v47 = vpop.f32.mrb[37].mxu1  ;;  %v2330_v0 = vadd.f32 %v1551_v58, %v763_v45 }
 0x5a9   :  { %v766_v49 = vpop.f32.mrb[38].mxu1 }
 0x5aa   :  { %v2309_v50 = vpop.eup %1907  ;;  %v1738_v51 = vpop.f32.mrb[39].mxu1  ;;  %v2318_v55 = vadd.f32 %v1552_v53, %v766_v49  ;;  %v785_v9 = vsel %vm330_vm4, %v2330_v0, -inf }
 0x5ab   :  { %v368_v52 = vsel %vm330_vm4, %v2309_v50, 0.0 }
 0x5ac   :  { %369 = vadd.xlane.f32.xlu1 %v368_v52  ;;  %v788_v2 = vsel %vm330_vm4, %v2318_v55, -inf  ;;  %v1566_v52 = vld [vmem:[%s2680_s4 + $0x98] sm:$0x3] }
 0x5ae   :  { %v2316_v54 = vpop.eup %1909 }
 0x5af   :  { %v771_v56 = vpop.f32.mrb[40].mxu1  ;;  %v371_v57 = vsel %vm330_vm4, %v2316_v54, 0.0 }
 0x5b0   :  { %v1741_v59 = vpop.f32.mrb[41].mxu1  ;;  %372 = vadd.xlane.f32.xlu0 %v371_v57  ;;  %v2341_v5 = vadd.f32 %v1553_v4, %v771_v56 }
 0x5b1   :  { %v774_v61 = vpop.f32.mrb[42].mxu1 }
 0x5b2   :  { %v2328_v62 = vpop.eup %1911  ;;  %v1742_v63 = vpop.f32.mrb[43].mxu1  ;;  %v2332_v1 = vadd.f32 %v1554_v60, %v774_v61  ;;  %v791_v16 = vsel %vm330_vm4, %v2341_v5, -inf }
 0x5b3   :  { %v374_v3 = vsel %vm343_vm5, %v2328_v62, 0.0 }
 0x5b4   :  { %789 = vmax.xlane.f32.xlu0 %v788_v2  ;;  %375 = vadd.xlane.f32.xlu1 %v374_v3  ;;  %v794_v7 = vsel %vm330_vm4, %v2332_v1, -inf }
 0x5b7   :  { %v779_v6 = vpop.f32.mrb[44].mxu1 }
 0x5b8   :  { %v1745_v12 = vpop.f32.mrb[45].mxu1  ;;  %795 = vmax.xlane.f32.xlu0 %v794_v7  ;;  %786 = vmax.xlane.f32.xlu1 %v785_v9  ;;  %v2350_v15 = vadd.f32 %v1555_v11, %v779_v6 }
 0x5b9   :  { %v782_v13 = vpop.f32.mrb[46].mxu1 }
 0x5ba   :  { %v1746_v14 = vpop.f32.mrb[47].mxu1  ;;  %v797_v22 = vsel %vm343_vm5, %v2350_v15, -inf }
 0x5bc   :  { %792 = vmax.xlane.f32.xlu1 %v791_v16 }
 0x5bf   :  { %v989_v20 = vpop.f32.mrb[48].mxu1 }
 0x5c0   :  { %v2362_v25 = vadd.f32 %v1562_v19, %v989_v20  ;;  %v1773_v26 = vpop.f32.mrb[49].mxu1  ;;  %798 = vmax.xlane.f32.xlu1 %v797_v22 }
 0x5c1   :  { %v992_v28 = vpop.f32.mrb[50].mxu1 }
 0x5c2   :  { %v2364_v29 = vadd.f32 %v1563_v23, %v992_v28  ;;  %v1774_v30 = vpop.f32.mrb[51].mxu1  ;;  %v1011_v31 = vsel %vm330_vm4, %v2362_v25, -inf }
 0x5c3   :  { %1012 = vmax.xlane.f32.xlu0 %v1011_v31 }
 0x5c4   :  { %v1014_v35 = vsel %vm330_vm4, %v2364_v29, -inf }
 0x5c5   :  { %1015 = vmax.xlane.f32.xlu1 %v1014_v35 }
 0x5c7   :  { %v997_v37 = vpop.f32.mrb[52].mxu1 }
 0x5c8   :  { %v2376_v40 = vadd.f32 %v1564_v36, %v997_v37  ;;  %v1777_v41 = vpop.f32.mrb[53].mxu1 }
 0x5c9   :  { %v1000_v44 = vpop.f32.mrb[54].mxu1 }
 0x5ca   :  { %v2378_v45 = vadd.f32 %v1565_v38, %v1000_v44  ;;  %v1778_v47 = vpop.f32.mrb[55].mxu1  ;;  %v1017_v49 = vsel %vm330_vm4, %v2376_v40, -inf }
 0x5cb   :  { %1018 = vmax.xlane.f32.xlu0 %v1017_v49 }
 0x5cc   :  { %v1020_v51 = vsel %vm330_vm4, %v2378_v45, -inf }
 0x5cd   :  { %1021 = vmax.xlane.f32.xlu1 %v1020_v51 }
 0x5cf   :  { %v1005_v53 = vpop.f32.mrb[56].mxu1 }
 0x5d0   :  { %v2387_v56 = vadd.f32 %v1566_v52, %v1005_v53  ;;  %v1781_v57 = vpop.f32.mrb[57].mxu1 }
 0x5d1   :  { %v1008_v58 = vpop.f32.mrb[58].mxu1 }
 0x5d2   :  { %v1782_v59 = vpop.f32.mrb[59].mxu1  ;;  %v1023_v60 = vsel %vm343_vm5, %v2387_v56, -inf }
 0x5d3   :  { %1024 = vmax.xlane.f32.xlu0 %v1023_v60 }
 0x5de   :  { %619 = vrot.lane.b32.xlu1 %v2112_v42, %s1999_s3 }
 0x5e9   :  { %617 = vrot.lane.b32.xlu0 %v2105_v32, %s1999_s3 }
 0x631   :  { %v364_v61 = vpop.xlane.xlu1 %363 }
 0x632   :  { %1913 = vrcp.f32 %v364_v61 }
 0x633   :  { %v367_v63 = vpop.xlane.xlu0 %366 }
 0x634   :  { %1915 = vrcp.f32 %v367_v63 }
 0x639   :  { %v370_v2 = vpop.xlane.xlu1 %369 }
 0x63a   :  { %1917 = vrcp.f32 %v370_v2 }
 0x63c   :  { %v1914_v3 = vpop.eup %1913 }
 0x63d   :  { %v373_v4 = vpop.xlane.xlu0 %372  ;;  %v2396_v7 = vmul.f32 %v1914_v3, %v2301_v34 }
 0x63e   :  { %v1916_v6 = vpop.eup %1915  ;;  %1919 = vrcp.f32 %v373_v4 }
 0x63f   :  { %v2399_v9 = vmul.f32 %v1916_v6, %v2305_v39 }
 0x641   :  { %v387_v42 = vpack.c.bf16 %v2399_v9, %v2396_v7  ;;  %v2403_v32 = vpop.xlane.xlu1 %375  ;;  %v790_v11 = vpop.xlane.xlu0 %789 }
 0x642   :  { %v801_v12 = vsub.f32 %v2318_v55, %v790_v11 }
 0x644   :  { %v807_v13 = vmul.f32 1.442695, %v801_v12  ;;  %v1918_v19 = vpop.eup %1917 }
 0x645   :  { %v787_v14 = vpop.xlane.xlu1 %786  ;;  %v796_v16 = vpop.xlane.xlu0 %795  ;;  %v2409_v26 = vmul.f32 %v1918_v19, %v2309_v50 }
 0x646   :  { %1921 = vpow2.f32 %v807_v13  ;;  %v800_v20 = vsub.f32 %v2330_v0, %v787_v14  ;;  %v803_v39 = vsub.f32 %v2332_v1, %v796_v16 }
 0x648   :  { %v1920_v34 = vpop.eup %1919  ;;  %v805_v22 = vmul.f32 1.442695, %v800_v20  ;;  %v811_v31 = vmul.f32 1.442695, %v803_v39 }
 0x649   :  { %v793_v23 = vpop.xlane.xlu1 %792  ;;  %v2412_v28 = vmul.f32 %v1920_v34, %v2316_v54 }
 0x64a   :  { %1923 = vpow2.f32 %v805_v22  ;;  %v802_v55 = vsub.f32 %v2341_v5, %v793_v23  ;;  %v234_v22 = vadd.f32 %v2122_v46, %v2101_v24 }
 0x64b   :  { %v388_v30 = vpack.c.bf16 %v2412_v28, %v2409_v26 }
 0x64c   :  { %v809_v35 = vmul.f32 1.442695, %v802_v55  ;;  %v845_v39 = vpack.c.bf16 %v234_v22, %v234_v22 }
 0x64d   :  { %v799_v0 = vpop.xlane.xlu1 %798 }
 0x64e   :  { %1925 = vpow2.f32 %v809_v35  ;;  %v804_v36 = vsub.f32 %v2350_v15, %v799_v0  ;;  %v856_v7 = vsel %vm557_vm6, %v845_v39, 0 }
 0x64f   :  { %1927 = vpow2.f32 %v811_v31 }
 0x650   :  { %v2418_v1 = vpop.eup %1921  ;;  %v813_v50 = vmul.f32 1.442695, %v804_v36  ;;  %v1013_v37 = vpop.xlane.xlu0 %1012 }
 0x651   :  { %v1026_v54 = vsub.f32 %v2362_v25, %v1013_v37  ;;  %v818_v38 = vsel %vm330_vm4, %v2418_v1, 0.0 }
 0x652   :  { %v1016_v5 = vpop.xlane.xlu1 %1015  ;;  %819 = vadd.xlane.f32.xlu0 %v818_v38  ;;  %1929 = vpow2.f32 %v813_v50 }
 0x653   :  { %v1031_v44 = vmul.f32 1.442695, %v1026_v54  ;;  %v1027_v47 = vsub.f32 %v2364_v29, %v1016_v5 }
 0x654   :  { %v2423_v41 = vpop.eup %1923 }
 0x655   :  { %v815_v15 = vsel %vm330_vm4, %v2423_v41, 0.0  ;;  %1931 = vpow2.f32 %v1031_v44  ;;  %v1033_v51 = vmul.f32 1.442695, %v1027_v47 }
 0x656   :  { %816 = vadd.xlane.f32.xlu1 %v815_v15 }
 0x657   :  { %1933 = vpow2.f32 %v1033_v51 }
 0x658   :  { %v2428_v49 = vpop.eup %1925  ;;  %v1019_v25 = vpop.xlane.xlu0 %1018 }
 0x659   :  { %v1028_v52 = vsub.f32 %v2376_v40, %v1019_v25  ;;  %v821_v53 = vsel %vm330_vm4, %v2428_v49, 0.0  ;;  %v2433_v57 = vpop.eup %1927 }
 0x65a   :  { %822 = vadd.xlane.f32.xlu1 %v821_v53  ;;  %v824_v29 = vsel %vm330_vm4, %v2433_v57, 0.0  ;;  %v1022_v63 = vpop.xlane.xlu1 %1021 }
 0x65b   :  { %v1035_v58 = vmul.f32 1.442695, %v1028_v52  ;;  %v1029_v14 = vsub.f32 %v2378_v45, %v1022_v63 }
 0x65c   :  { %v2437_v59 = vpop.eup %1929 }
 0x65d   :  { %1935 = vpow2.f32 %v1035_v58  ;;  %v827_v61 = vsel %vm343_vm5, %v2437_v59, 0.0  ;;  %v1037_v16 = vmul.f32 1.442695, %v1029_v14 }
 0x65e   :  { %825 = vadd.xlane.f32.xlu1 %v824_v29  ;;  %v620_v6 = vpop.permute.xlu1 %619 }
 0x65f   :  { %v2441_v40 = vpop.eup %1931  ;;  %1937 = vpow2.f32 %v1037_v16 }
 0x660   :  { %v1025_v60 = vpop.xlane.xlu0 %1024  ;;  %v1041_v3 = vsel %vm330_vm4, %v2441_v40, 0.0 }
 0x661   :  { %v2445_v4 = vpop.eup %1933  ;;  %v1030_v20 = vsub.f32 %v2387_v56, %v1025_v60 }
 0x662   :  { %828 = vadd.xlane.f32.xlu1 %v827_v61  ;;  %v1044_v11 = vsel %vm330_vm4, %v2445_v4, 0.0 }
 0x663   :  { %v1039_v34 = vmul.f32 1.442695, %v1030_v20 }
 0x664   :  { %v618_v2 = vpop.permute.xlu0 %617 }
 0x665   :  { %1712 = vmatpush3.bf16.msra.mxu0 %v618_v2  ;;  %1939 = vpow2.f32 %v1039_v34 }
 0x666   :  { %1042 = vadd.xlane.f32.xlu1 %v1041_v3  ;;  %1713 = vmatprep.subr.bf16.mxu0 %v1989_v18  ;;  %1941 = vrcp.f32 %v2403_v32 }
 0x667   :  { %v2452_v12 = vpop.eup %1935 }
 0x668   :  { %621 = vrot.lane.b32.xlu0 %v2124_v48, %s1999_s3  ;;  %v1047_v13 = vsel %vm330_vm4, %v2452_v12, 0.0 }
 0x669   :  { %1714 = vmatpush3.bf16.msra.mxu0 %v620_v6  ;;  %v2460_v48 = vpop.eup %1937 }
 0x66a   :  { %1045 = vadd.xlane.f32.xlu1 %v1044_v11  ;;  %1715 = vmatprep.subr.bf16.mxu0 %v1989_v18  ;;  %v1050_v19 = vsel %vm330_vm4, %v2460_v48, 0.0 }
 0x66e   :  { %1048 = vadd.xlane.f32.xlu1 %v1047_v13 }
 0x66f   :  { %v2469_v45 = vpop.eup %1939 }
 0x670   :  { %v1053_v23 = vsel %vm343_vm5, %v2469_v45, 0.0  ;;  %v1942_v32 = vpop.eup %1941 }
 0x67f   :  { %1072 = vrot.lane.b32.xlu1 %v2107_v33, %s1993_s17 }
 0x687   :  { %1051 = vadd.xlane.f32.xlu0 %v1050_v19 }
 0x69d   :  { %1074 = vrot.lane.b32.xlu0 %v2114_v43, %s1993_s17 }
 0x6a1   :  { %1076 = vrot.lane.b32.xlu0 %v845_v39, %s1993_s17 }
 0x6a3   :  { %1054 = vadd.xlane.f32.xlu1 %v1053_v23 }
 0x6df   :  { %v820_v55 = vpop.xlane.xlu0 %819 }
 0x6e3   :  { %v817_v31 = vpop.xlane.xlu1 %816  ;;  %v622_v56 = vpop.permute.xlu0 %621 }
 0x6e4   :  { %v635_v35 = vsel %vm557_vm6, %v622_v56, 0  ;;  %1943 = vrcp.f32 %v817_v31 }
 0x6e5   :  { %1716 = vmatpush3.bf16.msra.mxu0 %v635_v35  ;;  %1945 = vrcp.f32 %v820_v55 }
 0x6e6   :  { %1747 = vmatprep.subr.bf16.mxu0 %v1989_v18 }
 0x6e7   :  { %v823_v24 = vpop.xlane.xlu1 %822 }
 0x6e8   :  { %1718 = vmatmul.mubr.msk.bf16.vlgmr.msra.gmra.mrb[12].mxu0 %vm330_vm4, %v387_v42 }
 0x6e9   :  { %1748 = vmatpush3.bf16.msra.mxu0 %v2107_v33  ;;  %1721 = vmatprep.mubr.msk.bf16.mxu0 %vm1992_vm2, %v1989_v18  ;;  %v386_v33 = vmul.f32 %v1942_v32, %v2328_v62 }
 0x6ea   :  { %1749 = vmatprep.subr.bf16.mxu0 %v1989_v18 }
 0x6eb   :  { %v826_v46 = vpop.xlane.xlu1 %825  ;;  %v389_v9 = vpack.c.bf16 %v386_v33, %v386_v33 }
 0x6ec   :  { %1947 = vrcp.f32 %v826_v46 }
 0x6ed   :  { %1750 = vmatpush3.bf16.msra.mxu0 %v2114_v43  ;;  %1949 = vrcp.f32 %v823_v24 }
 0x6ee   :  { %1751 = vmatprep.subr.bf16.mxu0 %v1989_v18  ;;  %v1944_v42 = vpop.eup %1943 }
 0x6ef   :  { %v829_v0 = vpop.xlane.xlu1 %828  ;;  %v1946_v50 = vpop.eup %1945  ;;  %v835_v26 = vmul.f32 %v1944_v42, %v2423_v41 }
 0x6f0   :  { %1722 = vmatmul.mubr.msk.bf16.gmra.mrb[16].mxu0 %vm330_vm4, %v388_v30  ;;  %v836_v30 = vmul.f32 %v1946_v50, %v2418_v1  ;;  %1951 = vrcp.f32 %v829_v0 }
 0x6f1   :  { %1752 = vmatpush3.bf16.msra.mxu0 %v856_v7  ;;  %1725 = vmatprep.mubr.msk.bf16.mxu0 %vm1992_vm2, %v1989_v18 }
 0x6f2   :  { %1783 = vmatprep.subr.bf16.mxu0 %v1989_v18  ;;  %v840_v62 = vpack.c.bf16 %v836_v30, %v835_v26  ;;  %v1573_v30 = vld [vmem:[%s2678_s1 + $0x4] ss:$0 sm:$0xff] }
 0x6f3   :  { %v1043_v43 = vpop.xlane.xlu1 %1042 }
 0x6f6   :  { %v1948_v37 = vpop.eup %1947 }
 0x6f7   :  { %v1046_v36 = vpop.xlane.xlu1 %1045  ;;  %v1950_v38 = vpop.eup %1949  ;;  %v838_v5 = vmul.f32 %v1948_v37, %v2433_v57 }
 0x6f8   :  { %1726 = vmatmul.mubr.msk.bf16.gmra.mrb[20].mxu0 %vm330_vm4, %v389_v9  ;;  %v837_v41 = vmul.f32 %v1950_v38, %v2428_v49  ;;  %1953 = vrcp.f32 %v1046_v36  ;;  %v1574_v38 = vld [vmem:[%s2678_s1 + $0x6] ss:$0 sm:$0xff] }
 0x6f9   :  { %1753 = vmatprep.mubr.msk.bf16.mxu0 %vm1992_vm2, %v1989_v18  ;;  %1955 = vrcp.f32 %v1043_v43 }
 0x6fa   :  { %v841_v44 = vpack.c.bf16 %v838_v5, %v837_v41  ;;  %v1952_v47 = vpop.eup %1951 }
 0x6fb   :  { %v1049_v28 = vpop.xlane.xlu1 %1048  ;;  %v839_v1 = vmul.f32 %v1952_v47, %v2437_v59 }
 0x6fd   :  { %v842_v15 = vpack.c.bf16 %v839_v1, %v839_v1 }
 0x6ff   :  { %v1073_v54 = vpop.permute.xlu1 %1072 }
 0x700   :  { %1754 = vmatmul.mubr.msk.bf16.vlgmr.msra.gmra.mrb[24].mxu0 %vm330_vm4, %v840_v62 }
 0x701   :  { %1784 = vmatpush3.bf16.msra.mxu0 %v1073_v54  ;;  %1757 = vmatprep.mubr.msk.bf16.mxu0 %vm1992_vm2, %v1989_v18 }
 0x702   :  { %1785 = vmatprep.subr.bf16.mxu0 %v1989_v18  ;;  %v1954_v49 = vpop.eup %1953 }
 0x703   :  { %v1956_v52 = vpop.eup %1955  ;;  %v1062_v53 = vmul.f32 %v1954_v49, %v2445_v4  ;;  %v1983_v49 = vld [vmem:[%s2676_s0] sm:$0xff] }
 0x704   :  { %v1061_v58 = vmul.f32 %v1956_v52, %v2441_v40 }
 0x706   :  { %v1066_v59 = vpack.c.bf16 %v1062_v53, %v1061_v58 }
 0x708   :  { %1758 = vmatmul.mubr.msk.bf16.gmra.mrb[28].mxu0 %vm330_vm4, %v841_v44 }
 0x709   :  { %1761 = vmatprep.mubr.msk.bf16.mxu0 %vm1992_vm2, %v1989_v18 }
 0x710   :  { %1762 = vmatmul.mubr.msk.bf16.gmra.mrb[32].mxu0 %vm330_vm4, %v842_v15 }
 0x711   :  { %1789 = vmatprep.mubr.msk.bf16.mxu0 %vm1992_vm2, %v1989_v18 }
 0x714   :  { %v1052_v51 = vpop.xlane.xlu0 %1051 }
 0x715   :  { %1957 = vrcp.f32 %v1052_v51 }
 0x716   :  { %1959 = vrcp.f32 %v1049_v28 }
 0x718   :  { %v1075_v25 = vpop.permute.xlu0 %1074 }
 0x719   :  { %1786 = vmatpush3.bf16.msra.mxu0 %v1075_v25 }
 0x71a   :  { %1787 = vmatprep.subr.bf16.mxu0 %v1989_v18 }
 0x71c   :  { %v1077_v57 = vpop.permute.xlu0 %1076 }
 0x71d   :  { %v1090_v29 = vsel %vm557_vm6, %v1077_v57, 0 }
 0x71e   :  { %1788 = vmatpush3.bf16.msra.mxu0 %v1090_v29  ;;  %v1984_v29 = vld [vmem:[%s2676_s0 + $0x8] sm:$0xff] }
 0x71f   :  { %1817 = vmatprep.subr.bf16.mxu0 %v1989_v18  ;;  %v1958_v60 = vpop.eup %1957 }
 0x720   :  { %v1960_v61 = vpop.eup %1959  ;;  %v1064_v63 = vmul.f32 %v1958_v60, %v2460_v48 }
 0x721   :  { %1790 = vmatmul.mubr.msk.bf16.vlgmr.msra.gmra.mrb[36].mxu0 %vm330_vm4, %v1066_v59  ;;  %v1063_v2 = vmul.f32 %v1960_v61, %v2452_v12 }
 0x722   :  { %1793 = vmatprep.mubr.msk.bf16.mxu0 %vm1992_vm2, %v1989_v18 }
 0x723   :  { %v1067_v3 = vpack.c.bf16 %v1064_v63, %v1063_v2 }
 0x729   :  { %1794 = vmatmul.mubr.msk.bf16.gmra.mrb[40].mxu0 %vm330_vm4, %v1067_v3 }
 0x72a   :  { %1797 = vmatprep.mubr.msk.bf16.mxu0 %vm1992_vm2, %v1989_v18 }
 0x730   :  { %v1055_v40 = vpop.xlane.xlu1 %1054 }
 0x731   :  { %1961 = vrcp.f32 %v1055_v40 }
 0x73b   :  { %v1962_v4 = vpop.eup %1961 }
 0x73c   :  { %v1065_v6 = vmul.f32 %v1962_v4, %v2469_v45 }
 0x73e   :  { %v1068_v11 = vpack.c.bf16 %v1065_v6, %v1065_v6 }
 0x740   :  { %1798 = vmatmul.mubr.msk.bf16.gmra.mrb[44].mxu0 %vm330_vm4, %v1068_v11  ;;  %v1985_v11 = vld [vmem:[%s2676_s0 + $0x10] sm:$0xff] }
 0x741   :  { %1833 = vmatprep.mubr.msk.bf16.mxu0 %vm1992_vm2, %v1989_v18 }
 0x7bb   :  { %v671_v13 = vpop.f32.mrb[12].mxu0 }
 0x7bc   :  { %v672_v12 = vadd.f32 %v671_v13, %v2291_v8  ;;  %v1719_v14 = vpop.f32.mrb[13].mxu0 }
 0x7bd   :  { %v674_v16 = vpop.f32.mrb[14].mxu0  ;;  %v1986_v14 = vld [vmem:[%s2676_s0 + $0x18] sm:$0xff] }
 0x7be   :  { %v675_v48 = vadd.f32 %v674_v16, %v2293_v10  ;;  %v1720_v19 = vpop.f32.mrb[15].mxu0 }
 0x7c3   :  { %v679_v20 = vpop.f32.mrb[16].mxu0 }
 0x7c4   :  { %v680_v34 = vadd.f32 %v679_v20, %v2295_v17  ;;  %v1723_v22 = vpop.f32.mrb[17].mxu0 }
 0x7c5   :  { %v682_v39 = vpop.f32.mrb[18].mxu0 }
 0x7c6   :  { %v683_v45 = vadd.f32 %v682_v39, %v2297_v21  ;;  %v1724_v23 = vpop.f32.mrb[19].mxu0 }
 0x7cb   :  { %v687_v55 = vpop.f32.mrb[20].mxu0 }
 0x7cc   :  { %v688_v31 = vadd.f32 %v687_v55, %v2299_v27  ;;  %v1727_v56 = vpop.f32.mrb[21].mxu0  ;;  %v1987_v55 = vld [vmem:[%s2676_s0 + $0x20] sm:$0x3] }
 0x7cd   :  { %v690_v35 = vpop.f32.mrb[22].mxu0 }
 0x7ce   :  { %v1728_v24 = vpop.f32.mrb[23].mxu0 }
 0x7d3   :  { %v892_v8 = vpop.f32.mrb[24].mxu0 }
 0x7d4   :  { %v914_v46 = vadd.f32 %v892_v8, %v672_v12  ;;  %v1755_v32 = vpop.f32.mrb[25].mxu0 }
 0x7d5   :  { %v895_v0 = vpop.f32.mrb[26].mxu0 }
 0x7d6   :  { %v915_v10 = vadd.f32 %v895_v0, %v675_v48  ;;  %v1756_v7 = vpop.f32.mrb[27].mxu0 }
 0x7db   :  { %v900_v33 = vpop.f32.mrb[28].mxu0 }
 0x7dc   :  { %v916_v43 = vadd.f32 %v900_v33, %v680_v34  ;;  %v1759_v17 = vpop.f32.mrb[29].mxu0 }
 0x7dd   :  { %v903_v9 = vpop.f32.mrb[30].mxu0 }
 0x7de   :  { %v917_v42 = vadd.f32 %v903_v9, %v683_v45  ;;  %v1760_v36 = vpop.f32.mrb[31].mxu0 }
 0x7e3   :  { %v908_v21 = vpop.f32.mrb[32].mxu0 }
 0x7e4   :  { %v918_v50 = vadd.f32 %v908_v21, %v688_v31  ;;  %v1763_v26 = vpop.f32.mrb[33].mxu0 }
 0x7e5   :  { %v911_v28 = vpop.f32.mrb[34].mxu0 }
 0x7e6   :  { %v1764_v27 = vpop.f32.mrb[35].mxu0 }
 0x7f4   :  { %v1126_v62 = vpop.f32.mrb[36].mxu0 }
 0x7f5   :  { %v1148_v37 = vadd.f32 %v1126_v62, %v914_v46  ;;  %v1791_v54 = vpop.f32.mrb[37].mxu0 }
 0x7f6   :  { %v1129_v5 = vpop.f32.mrb[38].mxu0 }
 0x7f7   :  { %v1157_v41 = vadd.f32 %v1573_v30, %v1148_v37  ;;  %v1149_v44 = vadd.f32 %v1129_v5, %v915_v10  ;;  %v1792_v47 = vpop.f32.mrb[39].mxu0 }
 0x7f8   :  { %v1865_v47 = vld [vmem:[%s2682_s7] sm:$0xff]  }
 0x7f9   :  { %v1166_v1 = vmul.f32 %v1574_v38, %v1157_v41  ;;  %v1158_v15 = vadd.f32 %v1573_v30, %v1149_v44  ;;  %v1863_v41 = vld [vmem:[%s2681_s5] sm:$0xff]   ;;  %v1864_v44 = vld [vmem:[%s2681_s5 + $0x8] sm:$0xff]   ;;  %1818 = vmatpush3.bf16.msra.mxu0 %v1865_v47 }
 0x7fa   :  { %1802 = vmatpush3.bf16.msra.mxu1 %v1863_v41  ;;  %1819 = vmatprep.subr.bf16.mxu0 %v1989_v18 }
 0x7fb   :  { %v1167_v51 = vmul.f32 %v1574_v38, %v1158_v15  ;;  %v2545_v25 = vadd.f32 %v1983_v49, %v1166_v1  ;;  %1803 = vmatprep.subr.bf16.mxu1 %v1989_v18  ;;  %v1866_v1 = vld [vmem:[%s2682_s7 + $0x8] sm:$0xff]  }
 0x7fc   :  { %v1134_v52 = vpop.f32.mrb[40].mxu0 }
 0x7fd   :  { %v1150_v53 = vadd.f32 %v1134_v52, %v916_v43  ;;  %v1795_v57 = vpop.f32.mrb[41].mxu0  ;;  %v1176_v58 = vsel %vm43_vm0, %v2545_v25, 0.0  ;;  %v2552_v59 = vadd.f32 %v1984_v29, %v1167_v51  ;;  %1820 = vmatpush3.bf16.msra.mxu0 %v1866_v1 }
 0x7fe   :  { %1177 = vadd.xlane.f32.xlu1 %v1176_v58  ;;  %v1137_v60 = vpop.f32.mrb[42].mxu0  ;;  %1804 = vmatpush3.bf16.msra.mxu1 %v1864_v44 }
 0x7ff   :  { %v1159_v61 = vadd.f32 %v1573_v30, %v1150_v53  ;;  %v1151_v63 = vadd.f32 %v1137_v60, %v917_v42  ;;  %v1796_v2 = vpop.f32.mrb[43].mxu0  ;;  %v1179_v3 = vsel %vm43_vm0, %v2552_v59, 0.0  ;;  %1821 = vmatprep.subr.bf16.mxu0 %v1989_v18 }
 0x800   :  { %1180 = vadd.xlane.f32.xlu0 %v1179_v3 }
 0x801   :  { %v1168_v40 = vmul.f32 %v1574_v38, %v1159_v61  ;;  %v1160_v4 = vadd.f32 %v1573_v30, %v1151_v63 }
 0x803   :  { %v1169_v6 = vmul.f32 %v1574_v38, %v1160_v4  ;;  %v2559_v13 = vadd.f32 %v1985_v11, %v1168_v40  ;;  %v1575_v4 = vld [vmem:[%s2678_s1 + $0x2] ss:$0 sm:$0xff] }
 0x805   :  { %v1182_v12 = vsel %vm43_vm0, %v2559_v13, 0.0  ;;  %v2566_v16 = vadd.f32 %v1986_v14, %v1169_v6  ;;  %v1576_v14 = vld [vmem:[%s2678_s1 + $0x3] ss:$0 sm:$0xff] }
 0x806   :  { %1183 = vadd.xlane.f32.xlu1 %v1182_v12 }
 0x807   :  { %v1185_v48 = vsel %vm43_vm0, %v2566_v16, 0.0 }
 0x80a   :  { %1186 = vadd.xlane.f32.xlu1 %v1185_v48 }
 0x813   :  { %v1142_v19 = vpop.f32.mrb[44].mxu0 }
 0x814   :  { %v1152_v20 = vadd.f32 %v1142_v19, %v918_v50  ;;  %v1799_v34 = vpop.f32.mrb[45].mxu0 }
 0x815   :  { %v1145_v22 = vpop.f32.mrb[46].mxu0 }
 0x816   :  { %v1161_v39 = vadd.f32 %v1573_v30, %v1152_v20  ;;  %v1800_v45 = vpop.f32.mrb[47].mxu0 }
 0x818   :  { %v1170_v23 = vmul.f32 %v1574_v38, %v1161_v39 }
 0x81a   :  { %v2573_v31 = vadd.f32 %v1987_v55, %v1170_v23 }
 0x81c   :  { %v1188_v56 = vsel %vm56_vm1, %v2573_v31, 0.0 }
 0x81d   :  { %1189 = vadd.xlane.f32.xlu1 %v1188_v56 }
 0x88b   :  { %v1178_v35 = vpop.xlane.xlu1 %1177 }
 0x88c   :  { %v1191_v24 = vmul.f32 0.03125, %v1178_v35 }
 0x88d   :  { %v1181_v8 = vpop.xlane.xlu0 %1180 }
 0x88e   :  { %v1196_v46 = vsub.f32 %v2545_v25, %v1191_v24  ;;  %v1192_v32 = vmul.f32 0.03125, %v1181_v8 }
 0x890   :  { %v1197_v0 = vsub.f32 %v2552_v59, %v1192_v32  ;;  %v1201_v10 = vmul.f32 %v1196_v46, %v1196_v46 }
 0x892   :  { %v1206_v7 = vsel %vm43_vm0, %v1201_v10, 0.0  ;;  %v1202_v33 = vmul.f32 %v1197_v0, %v1197_v0 }
 0x893   :  { %v1184_v43 = vpop.xlane.xlu1 %1183  ;;  %1207 = vadd.xlane.f32.xlu1 %v1206_v7 }
 0x894   :  { %v1193_v17 = vmul.f32 0.03125, %v1184_v43  ;;  %v1209_v42 = vsel %vm43_vm0, %v1202_v33, 0.0 }
 0x896   :  { %v1198_v9 = vsub.f32 %v2559_v13, %v1193_v17 }
 0x897   :  { %v1187_v36 = vpop.xlane.xlu1 %1186  ;;  %1210 = vadd.xlane.f32.xlu1 %v1209_v42  ;;  %v1868_v42 = vld [vmem:[%s2682_s7 + $0x18] sm:$0xff]  }
 0x898   :  { %v1194_v21 = vmul.f32 0.03125, %v1187_v36  ;;  %v1203_v50 = vmul.f32 %v1198_v9, %v1198_v9  ;;  %v1869_v36 = vld [vmem:[%s2682_s7 + $0x20] sm:$0xff]  }
 0x89a   :  { %v1199_v26 = vsub.f32 %v2566_v16, %v1194_v21  ;;  %v1212_v28 = vsel %vm43_vm0, %v1203_v50, 0.0  ;;  %v1870_v21 = vld [vmem:[%s2682_s7 + $0x28] sm:$0xff]   ;;  %v1871_v50 = vld [vmem:[%s2682_s7 + $0x30] sm:$0xff]  }
 0x89b   :  { %1213 = vadd.xlane.f32.xlu1 %v1212_v28  ;;  %v1577_v28 = vld [vmem:[%s2683_s6] ss:$0 sm:$0xff] }
 0x89c   :  { %v1204_v27 = vmul.f32 %v1199_v26, %v1199_v26 }
 0x89e   :  { %v1215_v30 = vsel %vm43_vm0, %v1204_v27, 0.0 }
 0x89f   :  { %1216 = vadd.xlane.f32.xlu1 %v1215_v30 }
 0x8aa   :  { %v1190_v62 = vpop.xlane.xlu1 %1189 }
 0x8ab   :  { %v1195_v37 = vmul.f32 0.03125, %v1190_v62 }
 0x8ad   :  { %v1200_v54 = vsub.f32 %v2573_v31, %v1195_v37 }
 0x8af   :  { %v1205_v38 = vmul.f32 %v1200_v54, %v1200_v54 }
 0x8b1   :  { %v1218_v5 = vsel %vm56_vm1, %v1205_v38, 0.0 }
 0x8b2   :  { %1219 = vadd.xlane.f32.xlu1 %v1218_v5 }
 0x920   :  { %v1208_v15 = vpop.xlane.xlu1 %1207 }
 0x921   :  { %v1221_v51 = vmul.f32 0.03125, %v1208_v15 }
 0x923   :  { %v1226_v49 = vadd.f32 1e-05, %v1221_v51 }
 0x924   :  { %v1211_v52 = vpop.xlane.xlu1 %1210 }
 0x925   :  { %1963 = vrsqrt.f32 %v1226_v49  ;;  %v1222_v53 = vmul.f32 0.03125, %v1211_v52 }
 0x927   :  { %v1227_v57 = vadd.f32 1e-05, %v1222_v53 }
 0x928   :  { %v1214_v58 = vpop.xlane.xlu1 %1213 }
 0x929   :  { %1965 = vrsqrt.f32 %v1227_v57  ;;  %v1223_v29 = vmul.f32 0.03125, %v1214_v58 }
 0x92b   :  { %v1228_v60 = vadd.f32 1e-05, %v1223_v29 }
 0x92c   :  { %v1217_v61 = vpop.xlane.xlu1 %1216 }
 0x92d   :  { %1967 = vrsqrt.f32 %v1228_v60  ;;  %v1224_v63 = vmul.f32 0.03125, %v1217_v61 }
 0x92f   :  { %v1964_v2 = vpop.eup %1963  ;;  %v1229_v3 = vadd.f32 1e-05, %v1224_v63 }
 0x930   :  { %v1236_v40 = vmul.f32 %v1964_v2, %v1196_v46 }
 0x931   :  { %1969 = vrsqrt.f32 %v1229_v3 }
 0x932   :  { %v1245_v11 = vmul.f32 %v1575_v4, %v1236_v40 }
 0x933   :  { %v1966_v6 = vpop.eup %1965 }
 0x934   :  { %v1237_v12 = vmul.f32 %v1966_v6, %v1197_v0  ;;  %v1254_v20 = vadd.f32 %v1576_v14, %v1245_v11 }
 0x936   :  { %v1246_v48 = vmul.f32 %v1575_v4, %v1237_v12 }
 0x937   :  { %v1968_v19 = vpop.eup %1967 }
 0x938   :  { %v1255_v34 = vadd.f32 %v1576_v14, %v1246_v48  ;;  %v1238_v22 = vmul.f32 %v1968_v19, %v1198_v9  ;;  %v1867_v9 = vld [vmem:[%s2682_s7 + $0x10] sm:$0xff]  }
 0x939   :  { %1822 = vmatpush3.bf16.msra.mxu0 %v1867_v9 }
 0x93a   :  { %v1259_v39 = vpack.c.bf16 %v1255_v34, %v1254_v20  ;;  %v1247_v55 = vmul.f32 %v1575_v4, %v1238_v22  ;;  %1823 = vmatprep.subr.bf16.mxu0 %v1989_v18 }
 0x93b   :  { %v1970_v45 = vpop.eup %1969 }
 0x93c   :  { %v1239_v23 = vmul.f32 %v1970_v45, %v1199_v26  ;;  %1806 = vmatmul.mubr.msk.bf16.vlgmr.msra.gmra.mrb[60].mxu1 %vm43_vm0, %v1259_v39  ;;  %v1256_v8 = vadd.f32 %v1576_v14, %v1247_v55  ;;  %v1872_v26 = vld [vmem:[%s2682_s7 + $0x38] sm:$0xff]  }
 0x93d   :  { %1809 = vmatprep.mubr.msk.bf16.mxu1 %vm1992_vm2, %v1989_v18  ;;  %1824 = vmatpush3.bf16.msra.mxu0 %v1868_v42 }
 0x93e   :  { %v1248_v56 = vmul.f32 %v1575_v4, %v1239_v23  ;;  %1825 = vmatprep.subr.bf16.mxu0 %v1989_v18 }
 0x93f   :  { %v1220_v35 = vpop.xlane.xlu1 %1219 }
 0x940   :  { %v1225_v24 = vmul.f32 0.03125, %v1220_v35  ;;  %v1257_v46 = vadd.f32 %v1576_v14, %v1248_v56 }
 0x941   :  { %1826 = vmatpush3.bf16.msra.mxu0 %v1869_v36 }
 0x942   :  { %v1230_v32 = vadd.f32 1e-05, %v1225_v24  ;;  %v1260_v0 = vpack.c.bf16 %v1257_v46, %v1256_v8  ;;  %1827 = vmatprep.subr.bf16.mxu0 %v1989_v18 }
 0x944   :  { %1971 = vrsqrt.f32 %v1230_v32  ;;  %1810 = vmatmul.mubr.msk.bf16.gmra.mrb[64].mxu1 %vm43_vm0, %v1260_v0  ;;  %v1583_v0 = vld [vmem:[%s2678_s1 + $0x5] ss:$0 sm:$0xff] }
 0x945   :  { %1813 = vmatprep.mubr.msk.bf16.mxu1 %vm1992_vm2, %v1989_v18  ;;  %1828 = vmatpush3.bf16.msra.mxu0 %v1870_v21 }
 0x946   :  { %1829 = vmatprep.subr.bf16.mxu0 %v1989_v18 }
 0x949   :  { %1830 = vmatpush3.bf16.msra.mxu0 %v1871_v50 }
 0x94a   :  { %1831 = vmatprep.subr.bf16.mxu0 %v1989_v18 }
 0x94d   :  { %1832 = vmatpush3.bf16.msra.mxu0 %v1872_v26 }
 0x94e   :  { %v1972_v10 = vpop.eup %1971 }
 0x94f   :  { %v1240_v7 = vmul.f32 %v1972_v10, %v1200_v54  ;;  %v1592_v10 = vld [vmem:[%s2678_s1 + $0x7] ss:$0 sm:$0xff] }
 0x951   :  { %v1249_v33 = vmul.f32 %v1575_v4, %v1240_v7 }
 0x953   :  { %v1258_v43 = vadd.f32 %v1576_v14, %v1249_v33 }
 0x955   :  { %v1261_v17 = vpack.c.bf16 %v1258_v43, %v1258_v43 }
 0x957   :  { %1814 = vmatmul.mubr.msk.bf16.gmra.mrb[68].mxu1 %vm43_vm0, %v1261_v17 }
 0xa0f   :  { %v1328_v27 = vpop.f32.mrb[60].mxu1 }
 0xa10   :  { %v1329_v30 = vadd.f32 %v1577_v28, %v1328_v27  ;;  %v1807_v62 = vpop.f32.mrb[61].mxu1 }
 0xa11   :  { %v1331_v37 = vpop.f32.mrb[62].mxu1 }
 0xa12   :  { %v1355_v54 = vmul.f32 0.70710677, %v1329_v30  ;;  %v1332_v38 = vadd.f32 %v1577_v28, %v1331_v37  ;;  %v1808_v5 = vpop.f32.mrb[63].mxu1  ;;  %v1350_v60 = vmul.f32 0.5, %v1329_v30 }
 0xa14   :  { %1973 = verf.f32 %v1355_v54  ;;  %v1356_v41 = vmul.f32 0.70710677, %v1332_v38  ;;  %v1351_v61 = vmul.f32 0.5, %v1332_v38 }
 0xa16   :  { %1975 = verf.f32 %v1356_v41 }
 0xa17   :  { %v1336_v44 = vpop.f32.mrb[64].mxu1 }
 0xa18   :  { %v1337_v47 = vadd.f32 %v1577_v28, %v1336_v44  ;;  %v1811_v1 = vpop.f32.mrb[65].mxu1 }
 0xa19   :  { %v1339_v15 = vpop.f32.mrb[66].mxu1 }
 0xa1a   :  { %v1357_v51 = vmul.f32 0.70710677, %v1337_v47  ;;  %v1340_v49 = vadd.f32 %v1577_v28, %v1339_v15  ;;  %v1812_v52 = vpop.f32.mrb[67].mxu1  ;;  %v1352_v12 = vmul.f32 0.5, %v1337_v47 }
 0xa1c   :  { %1977 = verf.f32 %v1357_v51  ;;  %v1358_v53 = vmul.f32 0.70710677, %v1340_v49  ;;  %v1353_v14 = vmul.f32 0.5, %v1340_v49 }
 0xa1e   :  { %v1974_v57 = vpop.eup %1973  ;;  %1979 = verf.f32 %v1358_v53 }
 0xa1f   :  { %v1365_v58 = vadd.f32 1.0, %v1974_v57 }
 0xa20   :  { %v1976_v29 = vpop.eup %1975 }
 0xa21   :  { %v1366_v63 = vadd.f32 1.0, %v1976_v29  ;;  %v1370_v2 = vmul.f32 %v1365_v58, %v1350_v60 }
 0xa23   :  { %v1371_v3 = vmul.f32 %v1366_v63, %v1351_v61 }
 0xa25   :  { %v1375_v40 = vpack.c.bf16 %v1371_v3, %v1370_v2 }
 0xa26   :  { %v1978_v4 = vpop.eup %1977 }
 0xa27   :  { %v1367_v6 = vadd.f32 1.0, %v1978_v4  ;;  %1834 = vmatmul.mubr.bf16.vlgmr.msra.gmra.mrb[48].mxu0 %v1375_v40 }
 0xa28   :  { %v1980_v11 = vpop.eup %1979  ;;  %1837 = vmatprep.mubr.msk.bf16.mxu0 %vm1992_vm2, %v1989_v18 }
 0xa29   :  { %v1368_v48 = vadd.f32 1.0, %v1980_v11  ;;  %v1372_v20 = vmul.f32 %v1367_v6, %v1352_v12 }
 0xa2a   :  { %v1344_v19 = vpop.f32.mrb[68].mxu1 }
 0xa2b   :  { %v1373_v34 = vmul.f32 %v1368_v48, %v1353_v14  ;;  %v1345_v22 = vadd.f32 %v1577_v28, %v1344_v19  ;;  %v1815_v39 = vpop.f32.mrb[69].mxu1 }
 0xa2c   :  { %v1347_v45 = vpop.f32.mrb[70].mxu1 }
 0xa2d   :  { %v1359_v23 = vmul.f32 0.70710677, %v1345_v22  ;;  %v1816_v55 = vpop.f32.mrb[71].mxu1  ;;  %v1376_v56 = vpack.c.bf16 %v1373_v34, %v1372_v20  ;;  %v1354_v24 = vmul.f32 0.5, %v1345_v22 }
 0xa2f   :  { %1981 = verf.f32 %v1359_v23  ;;  %1838 = vmatmul.mubr.bf16.gmra.mrb[52].mxu0 %v1376_v56 }
 0xa30   :  { %1841 = vmatprep.mubr.msk.bf16.mxu0 %vm1992_vm2, %v1989_v18 }
 0xa39   :  { %v1982_v35 = vpop.eup %1981 }
 0xa3a   :  { %v1369_v8 = vadd.f32 1.0, %v1982_v35 }
 0xa3c   :  { %v1374_v46 = vmul.f32 %v1369_v8, %v1354_v24 }
 0xa3e   :  { %v1377_v32 = vpack.c.bf16 %v1374_v46, %v1374_v46 }
 0xa40   :  { %1842 = vmatmul.mubr.bf16.gmra.mrb[56].mxu0 %v1377_v32 }
 0xafa   :  { %v1480_v7 = vpop.f32.mrb[48].mxu0 }
 0xafb   :  { %v1481_v33 = vadd.f32 %v1583_v0, %v1480_v7  ;;  %v1835_v43 = vpop.f32.mrb[49].mxu0 }
 0xafc   :  { %v1483_v17 = vpop.f32.mrb[50].mxu0 }
 0xafd   :  { %v1506_v9 = vmul.f32 %v1592_v10, %v1481_v33  ;;  %v1484_v18 = vadd.f32 %v1583_v0, %v1483_v17  ;;  %v1836_v42 = vpop.f32.mrb[51].mxu0 }
 0xaff   :  { %v1511_v36 = vadd.f32 %v1506_v9, %v2545_v25  ;;  %v1507_v21 = vmul.f32 %v1592_v10, %v1484_v18 }
 0xb01   :  { %1516 = vst.msk [vmem:[%s2684_s8] sm:$0xff] %vm43_vm0, %v1511_v36  ;;  %v1512_v50 = vadd.f32 %v1507_v21, %v2552_v59 }
 0xb02   :  { %v1488_v26 = vpop.f32.mrb[52].mxu0 }
 0xb03   :  { %1517 = vst.msk [vmem:[%s2684_s8 + $0x8] sm:$0xff] %vm43_vm0, %v1512_v50  ;;  %v1489_v28 = vadd.f32 %v1583_v0, %v1488_v26  ;;  %v1839_v27 = vpop.f32.mrb[53].mxu0 }
 0xb04   :  { %v1491_v30 = vpop.f32.mrb[54].mxu0 }
 0xb05   :  { %v1508_v62 = vmul.f32 %v1592_v10, %v1489_v28  ;;  %v1492_v37 = vadd.f32 %v1583_v0, %v1491_v30  ;;  %v1840_v25 = vpop.f32.mrb[55].mxu0 }
 0xb07   :  { %v1513_v54 = vadd.f32 %v1508_v62, %v2559_v13  ;;  %v1509_v38 = vmul.f32 %v1592_v10, %v1492_v37 }
 0xb09   :  { %1518 = vst.msk [vmem:[%s2684_s8 + $0x10] sm:$0xff] %vm43_vm0, %v1513_v54  ;;  %v1514_v59 = vadd.f32 %v1509_v38, %v2566_v16 }
 0xb0b   :  { %1519 = vst.msk [vmem:[%s2684_s8 + $0x18] sm:$0xff] %vm43_vm0, %v1514_v59 }
 0xb13   :  { %v1496_v5 = vpop.f32.mrb[56].mxu0 }
 0xb14   :  { %v1497_v41 = vadd.f32 %v1583_v0, %v1496_v5  ;;  %v1843_v44 = vpop.f32.mrb[57].mxu0 }
 0xb15   :  { %v1499_v47 = vpop.f32.mrb[58].mxu0 }
 0xb16   :  { %v1510_v1 = vmul.f32 %v1592_v10, %v1497_v41  ;;  %v1844_v15 = vpop.f32.mrb[59].mxu0 }
 0xb18   :  { %v1515_v13 = vadd.f32 %v1510_v1, %v2573_v31 }
 0xb1a   :  { %1520 = vst.msk [vmem:[%s2684_s8 + $0x20] sm:$0x3] %vm56_vm1, %v1515_v13 }

</bundles_post_ra>
